<compile_context>
chip_gen: v6e
topology: v6e:2x2x1
jax: 0.10.0
libtpu: 0.0.40
codegen_flags: <defaults>
</compile_context>

<pallas_src>
import functools

import jax
import jax.numpy as jnp
from jax import lax
from jax.experimental import pallas as pl
from jax.experimental.pallas import tpu as pltpu


# ----------------------------------------------------------------------------
# Config mirroring the PyTorch module's __init__ arguments (synthetic, small).
# ----------------------------------------------------------------------------
DIM_DICT = {"direction": 8, "position": 8, "velocity": 16}   # input_size = 32
ENCODER_LAYER_NUM = 2                                         # 32 -> 16 -> 8
LATENT_DIM = 4
BATCH = 2

PAD = 128              # lane width of the packed weight slab / packed input
ONE_LANE = PAD - 1     # lane carrying the constant 1 that implements the bias via MXU


def _layer_dims(dim_dict, encoder_layer_num, latent_dim):
    """Reproduce the layer-size arithmetic from Encoder.__init__."""
    input_size = dim_dict["direction"] + dim_dict["position"] + dim_dict["velocity"]
    dims = [input_size]
    for _ in range(encoder_layer_num):
        input_size = input_size // 4 * 2
        dims.append(input_size)
    dims.append(latent_dim)
    return dims  # e.g. [32, 16, 8, 4]


def init_params(key, dims):
    """Init matching nn.Linear defaults. Weights stored (in, out) for x @ W."""
    params = []
    for i in range(len(dims) - 1):
        k_w, k_b, key = jax.random.split(key, 3)
        bound = 1.0 / float(dims[i]) ** 0.5
        w = jax.random.uniform(k_w, (dims[i], dims[i + 1]), jnp.float32, -bound, bound)
        b = jax.random.uniform(k_b, (dims[i + 1],), jnp.float32, -bound, bound)
        params.append((w, b))
    return params


def pack_params(params, dtype=jnp.float32, pad=PAD):
    """Pack per-layer (W, b) into one zero-padded slab (biases folded in).

    Layout of slab[i] (pad x pad):
      rows 0..din-1 , cols 0..dout-1 : W_i
      row  ONE_LANE , cols 0..dout-1 : b_i   (consumed by the constant-1 activation lane)
      row  ONE_LANE , col  ONE_LANE  : 1.0   (re-generates the constant lane; skipped on
                                              the last layer, whose padding is never read)
      everything else: 0 (so padded activation lanes stay exactly 0 through the chain)
    """
    num_layers = len(params)
    slab = jnp.zeros((num_layers, pad, pad), jnp.float32)
    for i, (w, b) in enumerate(params):
        din, dout = w.shape
        assert din < ONE_LANE and dout < ONE_LANE
        slab = slab.at[i, :din, :dout].set(w)
        slab = slab.at[i, ONE_LANE, :dout].set(b)
        if i < num_layers - 1:
            slab = slab.at[i, ONE_LANE, ONE_LANE].set(1.0)
    return slab.astype(dtype)


def _pack_inputs(direction, position, velocity, pad, dtype):
    """[dir | pos | vel | zeros | 1] -> lane-dense (B, pad) kernel input (tiny XLA op)."""
    batch = direction.shape[0]
    feat = jnp.concatenate((direction, position, velocity), axis=-1)
    n_feat = feat.shape[-1]
    assert n_feat < pad - 1
    pad_zeros = jnp.zeros((batch, pad - 1 - n_feat), feat.dtype)
    ones = jnp.ones((batch, 1), feat.dtype)
    return jnp.concatenate((feat, pad_zeros, ones), axis=-1).astype(dtype)


# ----------------------------------------------------------------------------
# Pallas kernel: full MLP, one MXU matmul per layer (bias via constant-1 lane).
# ----------------------------------------------------------------------------
def _make_encoder_kernel(num_layers, latent_dim):
    def kernel(x_ref, w_ref, out_ref):
        # f32 slabs: faithful f32 matmuls (multi-pass MXU). bf16 slabs: native MXU rate.
        prec = (lax.Precision.HIGHEST if x_ref.dtype == jnp.float32
                else lax.Precision.DEFAULT)
        h = x_ref[...]
        for i in range(num_layers):                       # static unroll (3 layers)
            h = jnp.dot(h, w_ref[i], preferred_element_type=jnp.float32,
                        precision=prec)
            if i < num_layers - 1:
                # ReLU; the constant-1 lane survives (1 > 0) and padded lanes stay 0,
                # so the next zero-padded matmul is a numerical no-op on the padding.
                h = jnp.maximum(h, 0.0).astype(x_ref.dtype)
        # Direct (B, latent_dim) store: masked vst of a few lanes, but no post-kernel
        # slice op and 32x fewer output bytes than a padded (B, 128) write.
        out_ref[...] = h[:, :latent_dim].astype(out_ref.dtype)

    return kernel


@functools.partial(jax.jit, static_argnames=("latent_dim", "batch_tile"))
def encoder_forward(direction, position, velocity, w_slab, *, latent_dim,
                    batch_tile=None):
    """Forward pass of Encoder: MLP over concat([direction, position, velocity])."""
    batch = direction.shape[0]
    num_layers, pad, _ = w_slab.shape
    dtype = w_slab.dtype

    x = _pack_inputs(direction, position, velocity, pad, dtype)
    kernel = _make_encoder_kernel(num_layers, latent_dim)

    # ---- choose a batch tile (static decision) ------------------------------------
    if batch_tile is None and batch > 4096:
        batch_tile = 2048                      # guard: never hold a huge un-tiled batch in VMEM
    tm = None
    if batch_tile is not None:
        tm = ((min(batch_tile, batch) + 7) // 8) * 8      # sublane alignment
        if dtype == jnp.float32:
            tm = min(tm, 256)                  # keep (TM,128) f32 activations register-resident
        if tm >= batch:
            tm = None                          # single tile -> skip the grid (no per-step cost)

    if tm is None:
        # Un-tiled path: whole arrays in VMEM.  Right choice for small batches and for
        # single-TC v5e/v6e up to a few thousand rows (grid steps would be pure overhead).
        return pl.pallas_call(
            kernel,
            out_shape=jax.ShapeDtypeStruct((batch, latent_dim), jnp.float32),
            in_specs=[pl.BlockSpec(memory_space=pltpu.MemorySpace.VMEM)] * 2,
            out_specs=pl.BlockSpec(memory_space=pltpu.MemorySpace.VMEM),
        )(x, w_slab)

    # Batch-tiled path (>= 2 steps shards across both v7x TensorCores via "parallel").
    padded_batch = ((batch + tm - 1) // tm) * tm
    if padded_batch != batch:
        x = jnp.pad(x, ((0, padded_batch - batch), (0, 0)))   # harden non-divisible batches
    out = pl.pallas_call(
        kernel,
        out_shape=jax.ShapeDtypeStruct((padded_batch, latent_dim), jnp.float32),
        grid=(padded_batch // tm,),
        in_specs=[
            pl.BlockSpec((tm, pad), lambda i: (i, 0)),
            # Constant index_map: the ~100-200 KB weight slab is DMA'd once and stays
            # VMEM-resident across all grid steps.
            pl.BlockSpec((num_layers, pad, pad), lambda i: (0, 0, 0)),
        ],
        out_specs=pl.BlockSpec((tm, latent_dim), lambda i: (i, 0)),
        compiler_params=pltpu.CompilerParams(dimension_semantics=("parallel",)),
    )(x, w_slab)
    if padded_batch != batch:
        out = out[:batch]
    return out


def encoder_reference(direction, position, velocity, params):
    """Pure-JAX reference of the PyTorch forward pass (unpadded params)."""
    h = jnp.concatenate((direction, position, velocity), axis=-1)
    n = len(params)
    for i, (w, b) in enumerate(params):
        h = jnp.dot(h, w, precision=lax.Precision.HIGHEST) + b
        if i < n - 1:
            h = jnp.maximum(h, 0.0)
    return h


if __name__ == "__main__":
    key = jax.random.PRNGKey(0)
    k_dir, k_pos, k_vel, k_par, k_big = jax.random.split(key, 5)

    dims = _layer_dims(DIM_DICT, ENCODER_LAYER_NUM, LATENT_DIM)   # [32, 16, 8, 4]
    params = init_params(k_par, dims)
    w_slab = pack_params(params, dtype=jnp.float32)

    # --- small per-step batch (B=2): un-tiled path, matches the module's typical call ---
    direction = jax.random.normal(k_dir, (BATCH, DIM_DICT["direction"]), jnp.float32)
    position = jax.random.normal(k_pos, (BATCH, DIM_DICT["position"]), jnp.float32)
    velocity = jax.random.normal(k_vel, (BATCH, DIM_DICT["velocity"]), jnp.float32)

    out = encoder_forward(direction, position, velocity, w_slab, latent_dim=LATENT_DIM)
    out = jax.block_until_ready(out)
    ref = encoder_reference(direction, position, velocity, params)
    assert out.shape == (BATCH, LATENT_DIM), out.shape
    assert jnp.allclose(out, ref, atol=1e-4, rtol=1e-4), (out, ref)

    # --- large batch, f32, batch grid (2 steps -> megacore sharding on v7x) -------------
    BIG_BATCH, TM = 512, 256
    kb1, kb2, kb3 = jax.random.split(k_big, 3)
    big_dir = jax.random.normal(kb1, (BIG_BATCH, DIM_DICT["direction"]), jnp.float32)
    big_pos = jax.random.normal(kb2, (BIG_BATCH, DIM_DICT["position"]), jnp.float32)
    big_vel = jax.random.normal(kb3, (BIG_BATCH, DIM_DICT["velocity"]), jnp.float32)

    big_out = encoder_forward(big_dir, big_pos, big_vel, w_slab,
                              latent_dim=LATENT_DIM, batch_tile=TM)
    big_out = jax.block_until_ready(big_out)
    big_ref = encoder_reference(big_dir, big_pos, big_vel, params)
    assert big_out.shape == (BIG_BATCH, LATENT_DIM), big_out.shape
    assert jnp.allclose(big_out, big_ref, atol=1e-4, rtol=1e-4)

    # --- non-divisible batch: zero-padded grid (hardened fallback), then row-sliced -----
    ODD = 300
    odd_out = encoder_forward(big_dir[:ODD], big_pos[:ODD], big_vel[:ODD], w_slab,
                              latent_dim=LATENT_DIM, batch_tile=128)
    odd_out = jax.block_until_ready(odd_out)
    assert odd_out.shape == (ODD, LATENT_DIM), odd_out.shape
    assert jnp.allclose(odd_out, big_ref[:ODD], atol=1e-4, rtol=1e-4)

    # --- bf16 operand knob (v6e/v7x): halved DMA bytes / vreg footprint -----------------
    w_slab_bf16 = pack_params(params, dtype=jnp.bfloat16)
    bf16_out = encoder_forward(big_dir, big_pos, big_vel, w_slab_bf16,
                               latent_dim=LATENT_DIM, batch_tile=TM)
    bf16_out = jax.block_until_ready(bf16_out)
    assert bf16_out.shape == (BIG_BATCH, LATENT_DIM), bf16_out.shape
    assert jnp.allclose(bf16_out, big_ref, atol=1e-1, rtol=1e-1)

    print("KERNEL_OK")
</pallas_src>

<mosaic_0001>
module attributes {stable_mosaic.version = 11 : i64} {
  func.func @kernel(%arg0: memref<2x128xf32, #tpu.memory_space<vmem>>, %arg1: memref<3x128x128xf32, #tpu.memory_space<vmem>>, %arg2: memref<2x4xf32, #tpu.memory_space<vmem>>) attributes {dimension_semantics = [], scalar_prefetch = 0 : i64, scratch_operands = 0 : i64, tpu.core_type = #tpu.core_type<tc>} {
    %c0 = arith.constant 0 : index
    %c0_0 = arith.constant 0 : index
    %0 = vector.load %arg0[%c0, %c0_0] : memref<2x128xf32, #tpu.memory_space<vmem>>, vector<2x128xf32>
    %c0_1 = arith.constant 0 : index
    %c0_2 = arith.constant 0 : index
    %c0_3 = arith.constant 0 : index
    %1 = vector.load %arg1[%c0_1, %c0_2, %c0_3] : memref<3x128x128xf32, #tpu.memory_space<vmem>>, vector<1x128x128xf32>
    %2 = vector.shape_cast %1 : vector<1x128x128xf32> to vector<128x128xf32>
    %cst = arith.constant dense<0.000000e+00> : vector<2x128xf32>
    %3 = tpu.matmul %0, %2, %cst {dimension_numbers = #tpu.dot_dimension_numbers<[1], [0], [0], [1], [0, 0, 1, 1], [], []>, precision = #tpu.contract_precision<fp32>} : vector<2x128xf32>, vector<128x128xf32>, vector<2x128xf32> -> vector<2x128xf32>
    %cst_4 = arith.constant 0.000000e+00 : f32
    %4 = vector.broadcast %cst_4 : f32 to vector<2x128xf32>
    %5 = arith.maximumf %3, %4 : vector<2x128xf32>
    %c1 = arith.constant 1 : index
    %c0_5 = arith.constant 0 : index
    %c0_6 = arith.constant 0 : index
    %6 = vector.load %arg1[%c1, %c0_5, %c0_6] : memref<3x128x128xf32, #tpu.memory_space<vmem>>, vector<1x128x128xf32>
    %7 = vector.shape_cast %6 : vector<1x128x128xf32> to vector<128x128xf32>
    %cst_7 = arith.constant dense<0.000000e+00> : vector<2x128xf32>
    %8 = tpu.matmul %5, %7, %cst_7 {dimension_numbers = #tpu.dot_dimension_numbers<[1], [0], [0], [1], [0, 0, 1, 1], [], []>, precision = #tpu.contract_precision<fp32>} : vector<2x128xf32>, vector<128x128xf32>, vector<2x128xf32> -> vector<2x128xf32>
    %cst_8 = arith.constant 0.000000e+00 : f32
    %9 = vector.broadcast %cst_8 : f32 to vector<2x128xf32>
    %10 = arith.maximumf %8, %9 : vector<2x128xf32>
    %c2 = arith.constant 2 : index
    %c0_9 = arith.constant 0 : index
    %c0_10 = arith.constant 0 : index
    %11 = vector.load %arg1[%c2, %c0_9, %c0_10] : memref<3x128x128xf32, #tpu.memory_space<vmem>>, vector<1x128x128xf32>
    %12 = vector.shape_cast %11 : vector<1x128x128xf32> to vector<128x128xf32>
    %cst_11 = arith.constant dense<0.000000e+00> : vector<2x128xf32>
    %13 = tpu.matmul %10, %12, %cst_11 {dimension_numbers = #tpu.dot_dimension_numbers<[1], [0], [0], [1], [0, 0, 1, 1], [], []>, precision = #tpu.contract_precision<fp32>} : vector<2x128xf32>, vector<128x128xf32>, vector<2x128xf32> -> vector<2x128xf32>
    %14 = vector.extract_strided_slice %13 {offsets = [0, 0], sizes = [2, 4], strides = [1, 1]} : vector<2x128xf32> to vector<2x4xf32>
    %c0_12 = arith.constant 0 : index
    %c0_13 = arith.constant 0 : index
    %15 = vector.load %arg2[%c0_12, %c0_13] : memref<2x4xf32, #tpu.memory_space<vmem>>, vector<2x4xf32>
    tpu.vector_store %arg2[%c0_12, %c0_13], %14 {strides = array<i32>} : memref<2x4xf32, #tpu.memory_space<vmem>>, vector<2x4xf32>,
    return
  }
}

</mosaic_0001>

<bundles_post_ra>
// kernel: encoder_forward.1
= control target key start
LH: loop header
LB: loop body
LE: loop exit
PB: predicated region body
PF: predicated region fallthrough
CT: control target
= control target key end

     0   :  { %7 = vsyncpa [#allocation3], 0  ;;  %s4116_s0 = inlined_call_operand.vmem [shape: f32[2,128], index: 0, kind: input, shape index: {}]   ;;  %s4117_s1 = inlined_call_operand.hbm [shape: f32[3,128,128], index: 1, kind: input, shape index: {}]   ;;  %s4118_s2 = inlined_call_operand.hbm [shape: f32[2,4], index: 2, kind: output, shape index: {}]  }
   0x1   :  { %8 = vsyncpa [#allocation4], 0  ;;  %s3005_s9 = smov [#allocation2]  }
   0x2   :  { %s16_s10 = sshll.u32 %s3005_s9, 4  ;;  %s17_s10 = int_to_ptr.vmem [resolvable:$true] %s16_s10 }
   0x3   :  { %s2969_s11 = scalar_lea.vmem %s17_s10, 6144  ;;  %p2974_p1 = scmp.lt.s32.totalorder %s17_s10, %s17_s10 }
   0x4   :  { %p2970_p0 = scmp.ne.s32.totalorder %s17_s10, %s2969_s11  ;;  %p2975_p2 = scmp.lt.s32.totalorder %s2969_s11, %s2969_s11 }
   0x6   :  { %p2976_p3 = por %p2975_p2, %p2974_p1 }
   0x8   :  { %p2977_p4 = pnand %p2976_p3, %p2970_p0 }
   0xa   :  { %2980 = shalt.err (!%p2977_p4)
}
   0xb   :  { %s3006_s12 = smov 128   ;;  %s3007_s13 = smov 8  }
   0xc   :  { %22 = dma.hbm_to_vmem [thread:$0]  %s4117_s1, 6144, %s17_s10, [#allocation3], %s3006_s12, %s3006_s12, %s3007_s13  }
   0xd   :  { %3001 = dma.done.wait [#allocation3], 6144  }
   0xe   :  { %3002 = vsyncadd [#allocation3], 4294961152  ;;  %v3008_v0 = vmov 0.0   ;;  %vm3009_vm0 = vmmov 0   ;;  %v42_v1 = vld [vmem:[#allocation2 + $0x78] sm:$0xff]  ;;  %v41_v2 = vld [vmem:[#allocation2 + $0x70] sm:$0xff] }
   0xf   :  { %2325 = vmatprep.subr.mxu0 %v3008_v0  ;;  %2360 = vmatprep.subr.mxu1 %v3008_v0  ;;  %v40_v3 = vld [vmem:[#allocation2 + $0x68] sm:$0xff]  ;;  %v3035_v4 = vand.u32 4294901760, %v42_v1  ;;  %v3037_v5 = vand.u32 4294901760, %v41_v2  ;;  %v39_v7 = vld [vmem:[#allocation2 + $0x60] sm:$0xff]  ;;  %v38_v8 = vld [vmem:[#allocation2 + $0x58] sm:$0xff]  ;;  %vm2002_vm1 = vcmask 25600  }
  0x10   :  { %2357 = vmatprep.mubr.msk.f32.mxu0 %vm3009_vm0, %v3008_v0  ;;  %2392 = vmatprep.mubr.msk.f32.mxu1 %vm3009_vm0, %v3008_v0  ;;  %v3039_v6 = vand.u32 4294901760, %v40_v3  ;;  %v37_v9 = vld [vmem:[#allocation2 + $0x50] sm:$0xff]  ;;  %v3041_v10 = vand.u32 4294901760, %v39_v7  ;;  %v3043_v11 = vand.u32 4294901760, %v38_v8  ;;  %v36_v13 = vld [vmem:[#allocation2 + $0x48] sm:$0xff]  ;;  %v35_v14 = vld [vmem:[#allocation2 + $0x40] sm:$0xff] }
  0x11   :  { %v3045_v12 = vand.u32 4294901760, %v37_v9  ;;  %2326 = vmatpush3.msra.mxu0 %v3035_v4  ;;  %v3049_v15 = vsub.f32 %v42_v1, %v3035_v4  ;;  %v3052_v16 = vsub.f32 %v41_v2, %v3037_v5  ;;  %v3054_v17 = vand.u32 4294901760, %v36_v13  ;;  %v34_v19 = vld [vmem:[#allocation2 + $0x38] sm:$0xff]  ;;  %v33_v26 = vld [vmem:[#allocation2 + $0x30] sm:$0xff]  ;;  %v32_v36 = vld [vmem:[#allocation2 + $0x28] sm:$0xff] }
  0x12   :  { %v3057_v18 = vsub.f32 %v40_v3, %v3039_v6  ;;  %2327 = vmatprep.subr.mxu0 %v3008_v0  ;;  %v3061_v20 = vsub.f32 %v39_v7, %v3041_v10  ;;  %v3064_v21 = vsub.f32 %v38_v8, %v3043_v11  ;;  %v3070_v25 = vand.u32 4294901760, %v35_v14  ;;  %v31_v41 = vld [vmem:[#allocation2 + $0x20] sm:$0xff]  ;;  %v30_v49 = vld [vmem:[#allocation2 + $0x18] sm:$0xff]  ;;  %v29_v54 = vld [vmem:[#allocation2 + $0x10] sm:$0xff] }
  0x13   :  { %2328 = vmatpush3.msra.mxu0 %v3037_v5  ;;  %v137_v22 = vand.u32 4294901760, %v3049_v15  ;;  %v144_v23 = vand.u32 4294901760, %v3052_v16  ;;  %v3074_v28 = vand.u32 4294901760, %v34_v19  ;;  %v3078_v30 = vsub.f32 %v37_v9, %v3045_v12  ;;  %v26_v50 = vld [vmem:[%s4116_s0] sm:$0x3]  ;;  %v28_v60 = vld [vmem:[#allocation2 + $0x8] sm:$0xff] }
  0x14   :  { %v151_v24 = vand.u32 4294901760, %v3057_v18  ;;  %2329 = vmatprep.subr.mxu0 %v3008_v0  ;;  %v158_v27 = vand.u32 4294901760, %v3061_v20  ;;  %v165_v29 = vand.u32 4294901760, %v3064_v21  ;;  %v3091_v34 = vsub.f32 %v36_v13, %v3054_v17  ;;  %v27_v7 = vld [vmem:[#allocation2] sm:$0xff]  ;;  %s3010_s0 = smov [#allocation5]  }
  0x15   :  { %2330 = vmatpush3.msra.mxu0 %v3039_v6  ;;  %v138_v31 = vsub.f32 %v3049_v15, %v137_v22  ;;  %v145_v32 = vsub.f32 %v3052_v16, %v144_v23  ;;  %v3094_v35 = vand.u32 4294901760, %v33_v26  ;;  %v172_v40 = vand.u32 4294901760, %v3078_v30  ;;  %s2010_s17 = sshll.u32 %s3010_s0, 4  ;;  %s2011_s17 = int_to_ptr.vmem [resolvable:$true] %s2010_s17 }
  0x16   :  { %v152_v33 = vsub.f32 %v3057_v18, %v151_v24  ;;  %2331 = vmatprep.subr.mxu0 %v3008_v0  ;;  %v159_v39 = vsub.f32 %v3061_v20, %v158_v27  ;;  %v166_v42 = vsub.f32 %v3064_v21, %v165_v29  ;;  %v3106_v43 = vsub.f32 %v35_v14, %v3070_v25  ;;  %s2981_s18 = scalar_lea.vmem %s2011_s17, 32  ;;  %p2986_p6 = scmp.lt.s32.totalorder %s2011_s17, %s2011_s17 }
  0x17   :  { %2332 = vmatpush3.msra.mxu0 %v3041_v10  ;;  %v139_v37 = vand.u32 4294901760, %v138_v31  ;;  %v146_v38 = vand.u32 4294901760, %v145_v32  ;;  %v3109_v45 = vand.u32 4294901760, %v32_v36  ;;  %v179_v46 = vand.u32 4294901760, %v3091_v34  ;;  %p2982_p5 = scmp.ne.s32.totalorder %s2011_s17, %s2981_s18  ;;  %p2987_p7 = scmp.lt.s32.totalorder %s2981_s18, %s2981_s18 }
  0x18   :  { %2333 = vmatprep.subr.mxu0 %v3008_v0  ;;  %v153_v44 = vand.u32 4294901760, %v152_v33  ;;  %v3113_v47 = vsub.f32 %v34_v19, %v3074_v28  ;;  %v3117_v48 = vand.u32 4294901760, %v31_v41  ;;  %v160_v51 = vand.u32 4294901760, %v159_v39 }
  0x19   :  { %2334 = vmatpush3.msra.mxu0 %v3043_v11  ;;  %2361 = vmatpush3.msra.mxu1 %v139_v37  ;;  %v173_v52 = vsub.f32 %v3078_v30, %v172_v40  ;;  %v186_v53 = vand.u32 4294901760, %v3106_v43  ;;  %v3128_v55 = vsub.f32 %v33_v26, %v3094_v35  ;;  %v167_v56 = vand.u32 4294901760, %v166_v42  ;;  %p2988_p8 = por %p2987_p7, %p2986_p6 }
  0x1a   :  { %2335 = vmatprep.subr.mxu0 %v3008_v0  ;;  %2362 = vmatprep.subr.mxu1 %v3008_v0  ;;  %v193_v57 = vand.u32 4294901760, %v3113_v47  ;;  %v180_v58 = vsub.f32 %v3091_v34, %v179_v46  ;;  %v3137_v59 = vand.u32 4294901760, %v30_v49  ;;  %v3140_v61 = vsub.f32 %v32_v36, %v3109_v45 }
  0x1b   :  { %2336 = vmatpush3.msra.mxu0 %v3045_v12  ;;  %2363 = vmatpush3.msra.mxu1 %v146_v38  ;;  %v3142_v62 = vand.u32 4294901760, %v26_v50  ;;  %v3146_v63 = vand.u32 4294901760, %v29_v54  ;;  %v174_v1 = vand.u32 4294901760, %v173_v52  ;;  %v187_v2 = vsub.f32 %v3106_v43, %v186_v53  ;;  %p2989_p9 = pnand %p2988_p8, %p2982_p5 }
  0x1c   :  { %2337 = vmatprep.subr.mxu0 %v3008_v0  ;;  %2364 = vmatprep.subr.mxu1 %v3008_v0  ;;  %v200_v3 = vand.u32 4294901760, %v3128_v55  ;;  %v3154_v8 = vsub.f32 %v31_v41, %v3117_v48  ;;  %v194_v9 = vsub.f32 %v3113_v47, %v193_v57  ;;  %v3161_v13 = vand.u32 4294901760, %v28_v60 }
  0x1d   :  { %2338 = vmatpush3.msra.mxu0 %v3054_v17  ;;  %2365 = vmatpush3.msra.mxu1 %v153_v44  ;;  %v181_v14 = vand.u32 4294901760, %v180_v58  ;;  %v207_v19 = vand.u32 4294901760, %v3140_v61  ;;  %v3166_v26 = vsub.f32 %v26_v50, %v3142_v62  ;;  %v3169_v31 = vsub.f32 %v30_v49, %v3137_v59 }
  0x1e   :  { %2339 = vmatprep.subr.mxu0 %v3008_v0  ;;  %2366 = vmatprep.subr.mxu1 %v3008_v0  ;;  %v3173_v32 = vand.u32 4294901760, %v27_v7  ;;  %v188_v33 = vand.u32 4294901760, %v187_v2  ;;  %v201_v36 = vsub.f32 %v3128_v55, %v200_v3  ;;  %v214_v37 = vand.u32 4294901760, %v3154_v8 }
  0x1f   :  { %2340 = vmatpush3.msra.mxu0 %v3070_v25  ;;  %2367 = vmatpush3.msra.mxu1 %v160_v51  ;;  %v3181_v38 = vsub.f32 %v29_v54, %v3146_v63  ;;  %v195_v39 = vand.u32 4294901760, %v194_v9  ;;  %v208_v41 = vsub.f32 %v3140_v61, %v207_v19  ;;  %v126_v42 = vand.u32 4294901760, %v3166_v26 }
  0x20   :  { %2341 = vmatprep.subr.mxu0 %v3008_v0  ;;  %2368 = vmatprep.subr.mxu1 %v3008_v0  ;;  %v221_v44 = vand.u32 4294901760, %v3169_v31  ;;  %v3192_v49 = vsub.f32 %v28_v60, %v3161_v13  ;;  %v202_v50 = vand.u32 4294901760, %v201_v36  ;;  %v215_v51 = vsub.f32 %v3154_v8, %v214_v37 }
  0x21   :  { %2342 = vmatpush3.msra.mxu0 %v3074_v28  ;;  %2369 = vmatpush3.msra.mxu1 %v167_v56  ;;  %v228_v52 = vand.u32 4294901760, %v3181_v38  ;;  %v3202_v54 = vsub.f32 %v27_v7, %v3173_v32  ;;  %v209_v56 = vand.u32 4294901760, %v208_v41  ;;  %v127_v58 = vsub.f32 %v3166_v26, %v126_v42 }
  0x22   :  { %2343 = vmatprep.subr.mxu0 %v3008_v0  ;;  %2370 = vmatprep.subr.mxu1 %v3008_v0  ;;  %v222_v60 = vsub.f32 %v3169_v31, %v221_v44  ;;  %v216_v2 = vand.u32 4294901760, %v215_v51 }
  0x23   :  { %2344 = vmatpush3.msra.mxu0 %v3094_v35  ;;  %2371 = vmatpush3.msra.mxu1 %v174_v1  ;;  %v235_v1 = vand.u32 4294901760, %v3192_v49  ;;  %v229_v7 = vsub.f32 %v3181_v38, %v228_v52  ;;  %v242_v9 = vand.u32 4294901760, %v3202_v54 }
  0x24   :  { %2345 = vmatprep.subr.mxu0 %v3008_v0  ;;  %2372 = vmatprep.subr.mxu1 %v3008_v0 }
  0x25   :  { %2346 = vmatpush3.msra.mxu0 %v3109_v45  ;;  %2373 = vmatpush3.msra.mxu1 %v181_v14  ;;  %v128_v14 = vand.u32 4294901760, %v127_v58  ;;  %v236_v36 = vsub.f32 %v3192_v49, %v235_v1  ;;  %v243_v41 = vsub.f32 %v3202_v54, %v242_v9  ;;  %v692_v58 = vld [vmem:[#allocation2 + $0xb0] sm:$0xff] }
  0x26   :  { %2347 = vmatprep.subr.mxu0 %v3008_v0  ;;  %2374 = vmatprep.subr.mxu1 %v3008_v0 }
  0x27   :  { %2348 = vmatpush3.msra.mxu0 %v3117_v48  ;;  %2375 = vmatpush3.msra.mxu1 %v188_v33  ;;  %v223_v33 = vand.u32 4294901760, %v222_v60  ;;  %v244_v51 = vand.u32 4294901760, %v243_v41 }
  0x28   :  { %2349 = vmatprep.subr.mxu0 %v3008_v0  ;;  %2376 = vmatprep.subr.mxu1 %v3008_v0 }
  0x29   :  { %2350 = vmatpush3.msra.mxu0 %v3137_v59  ;;  %2377 = vmatpush3.msra.mxu1 %v195_v39  ;;  %v230_v39 = vand.u32 4294901760, %v229_v7  ;;  %v691_v7 = vld [vmem:[#allocation2 + $0xa8] sm:$0xff] }
  0x2a   :  { %2351 = vmatprep.subr.mxu0 %v3008_v0  ;;  %2378 = vmatprep.subr.mxu1 %v3008_v0 }
  0x2b   :  { %2352 = vmatpush3.msra.mxu0 %v3146_v63  ;;  %2379 = vmatpush3.msra.mxu1 %v202_v50  ;;  %v237_v50 = vand.u32 4294901760, %v236_v36  ;;  %v690_v36 = vld [vmem:[#allocation2 + $0xa0] sm:$0xff] }
  0x2c   :  { %2353 = vmatprep.subr.mxu0 %v3008_v0  ;;  %2380 = vmatprep.subr.mxu1 %v3008_v0 }
  0x2d   :  { %2354 = vmatpush3.msra.mxu0 %v3161_v13  ;;  %2381 = vmatpush3.msra.mxu1 %v209_v56 }
  0x2e   :  { %2355 = vmatprep.subr.mxu0 %v3008_v0  ;;  %2382 = vmatprep.subr.mxu1 %v3008_v0 }
  0x2f   :  { %2356 = vmatpush3.msra.mxu0 %v3173_v32  ;;  %2383 = vmatpush3.msra.mxu1 %v216_v2  ;;  %v3501_v2 = vand.u32 4294901760, %v692_v58 }
  0x30   :  { %2384 = vmatprep.subr.mxu1 %v3008_v0  ;;  %2395 = vmatprep.subr.mxu0 %v3008_v0 }
  0x31   :  { %2358 = vmatmul.mubr.f32.vlgmr.msra.gmra.mxu0 %v128_v14  ;;  %2385 = vmatpush3.msra.mxu1 %v223_v33  ;;  %v3507_v14 = vsub.f32 %v692_v58, %v3501_v2  ;;  %v3509_v33 = vand.u32 4294901760, %v691_v7 }
  0x32   :  { %2396 = vmatpush3.msra.mxu0 %v3049_v15  ;;  %2386 = vmatprep.subr.mxu1 %v3008_v0  ;;  %v698_v15 = vld [vmem:[#allocation2 + $0xe0] sm:$0xff] }
  0x33   :  { %2397 = vmatprep.subr.mxu0 %v3008_v0  ;;  %2387 = vmatpush3.msra.mxu1 %v230_v39  ;;  %v859_v41 = vand.u32 4294901760, %v3507_v14 }
  0x34   :  { %2398 = vmatpush3.msra.mxu0 %v3052_v16  ;;  %2388 = vmatprep.subr.mxu1 %v3008_v0  ;;  %v697_v16 = vld [vmem:[#allocation2 + $0xd8] sm:$0xff] }
  0x35   :  { %2399 = vmatprep.subr.mxu0 %v3008_v0  ;;  %2389 = vmatpush3.msra.mxu1 %v237_v50  ;;  %v3516_v50 = vsub.f32 %v691_v7, %v3509_v33 }
  0x36   :  { %2400 = vmatpush3.msra.mxu0 %v3057_v18  ;;  %2390 = vmatprep.subr.mxu1 %v3008_v0 }
  0x37   :  { %2401 = vmatprep.subr.mxu0 %v3008_v0  ;;  %2391 = vmatpush3.msra.mxu1 %v244_v51  ;;  %v3518_v51 = vand.u32 4294901760, %v690_v36 }
  0x38   :  { %2402 = vmatpush3.msra.mxu0 %v3061_v20  ;;  %2393 = vmatmul.mubr.f32.vlgmr.msra.gmra.mxu1 %v3142_v62 }
  0x39   :  { %2403 = vmatprep.subr.mxu0 %v3008_v0  ;;  %2430 = vmatprep.subr.mxu1 %v3008_v0 }
  0x3a   :  { %2404 = vmatpush3.msra.mxu0 %v3064_v21  ;;  %2431 = vmatpush3.msra.mxu1 %v3035_v4  ;;  %v3416_v21 = vand.u32 4294901760, %v698_v15 }
  0x3b   :  { %2405 = vmatprep.subr.mxu0 %v3008_v0  ;;  %2432 = vmatprep.subr.mxu1 %v3008_v0 }
  0x3c   :  { %2406 = vmatpush3.msra.mxu0 %v3078_v30  ;;  %2433 = vmatpush3.msra.mxu1 %v3037_v5 }
  0x3d   :  { %2407 = vmatprep.subr.mxu0 %v3008_v0  ;;  %2434 = vmatprep.subr.mxu1 %v3008_v0 }
  0x3e   :  { %2408 = vmatpush3.msra.mxu0 %v3091_v34  ;;  %2435 = vmatpush3.msra.mxu1 %v3039_v6 }
  0x3f   :  { %2409 = vmatprep.subr.mxu0 %v3008_v0  ;;  %2436 = vmatprep.subr.mxu1 %v3008_v0 }
  0x40   :  { %2410 = vmatpush3.msra.mxu0 %v3106_v43  ;;  %2437 = vmatpush3.msra.mxu1 %v3041_v10 }
  0x41   :  { %2411 = vmatprep.subr.mxu0 %v3008_v0  ;;  %2438 = vmatprep.subr.mxu1 %v3008_v0 }
  0x42   :  { %2412 = vmatpush3.msra.mxu0 %v3113_v47  ;;  %2439 = vmatpush3.msra.mxu1 %v3043_v11 }
  0x43   :  { %2413 = vmatprep.subr.mxu0 %v3008_v0  ;;  %2440 = vmatprep.subr.mxu1 %v3008_v0 }
  0x44   :  { %2414 = vmatpush3.msra.mxu0 %v3128_v55  ;;  %2441 = vmatpush3.msra.mxu1 %v3045_v12 }
  0x45   :  { %2415 = vmatprep.subr.mxu0 %v3008_v0  ;;  %2442 = vmatprep.subr.mxu1 %v3008_v0 }
  0x46   :  { %2416 = vmatpush3.msra.mxu0 %v3140_v61  ;;  %2443 = vmatpush3.msra.mxu1 %v3054_v17 }
  0x47   :  { %2417 = vmatprep.subr.mxu0 %v3008_v0  ;;  %2444 = vmatprep.subr.mxu1 %v3008_v0 }
  0x48   :  { %2418 = vmatpush3.msra.mxu0 %v3154_v8  ;;  %2445 = vmatpush3.msra.mxu1 %v3070_v25 }
  0x49   :  { %2419 = vmatprep.subr.mxu0 %v3008_v0  ;;  %2446 = vmatprep.subr.mxu1 %v3008_v0 }
  0x4a   :  { %2420 = vmatpush3.msra.mxu0 %v3169_v31  ;;  %2447 = vmatpush3.msra.mxu1 %v3074_v28 }
  0x4b   :  { %2421 = vmatprep.subr.mxu0 %v3008_v0  ;;  %2448 = vmatprep.subr.mxu1 %v3008_v0 }
  0x4c   :  { %2422 = vmatpush3.msra.mxu0 %v3181_v38  ;;  %2449 = vmatpush3.msra.mxu1 %v3094_v35 }
  0x4d   :  { %2423 = vmatprep.subr.mxu0 %v3008_v0  ;;  %2450 = vmatprep.subr.mxu1 %v3008_v0 }
  0x4e   :  { %2424 = vmatpush3.msra.mxu0 %v3192_v49  ;;  %2451 = vmatpush3.msra.mxu1 %v3109_v45 }
  0x4f   :  { %2425 = vmatprep.subr.mxu0 %v3008_v0  ;;  %2452 = vmatprep.subr.mxu1 %v3008_v0 }
  0x50   :  { %2426 = vmatpush3.msra.mxu0 %v3202_v54  ;;  %2427 = vmatprep.mubr.msk.f32.mxu0 %vm3009_vm0, %v3008_v0 }
  0x51   :  { %2453 = vmatpush3.msra.mxu1 %v3117_v48  ;;  %2428 = vmatmul.mubr.f32.vlgmr.msra.gmra.mxu0 %v3166_v26 }
  0x52   :  { %2454 = vmatprep.subr.mxu1 %v3008_v0  ;;  %2465 = vmatprep.subr.mxu0 %v3008_v0 }
  0x53   :  { %2455 = vmatpush3.msra.mxu1 %v3137_v59  ;;  %2466 = vmatpush3.msra.mxu0 %v137_v22  ;;  %v696_v22 = vld [vmem:[#allocation2 + $0xd0] sm:$0xff] }
  0x54   :  { %2456 = vmatprep.subr.mxu1 %v3008_v0  ;;  %2467 = vmatprep.subr.mxu0 %v3008_v0 }
  0x55   :  { %2457 = vmatpush3.msra.mxu1 %v3146_v63  ;;  %2468 = vmatpush3.msra.mxu0 %v144_v23  ;;  %v695_v23 = vld [vmem:[#allocation2 + $0xc8] sm:$0xff] }
  0x56   :  { %2458 = vmatprep.subr.mxu1 %v3008_v0  ;;  %2469 = vmatprep.subr.mxu0 %v3008_v0 }
  0x57   :  { %2459 = vmatpush3.msra.mxu1 %v3161_v13  ;;  %2470 = vmatpush3.msra.mxu0 %v151_v24  ;;  %v694_v24 = vld [vmem:[#allocation2 + $0xc0] sm:$0xff] }
  0x58   :  { %2460 = vmatprep.subr.mxu1 %v3008_v0  ;;  %2471 = vmatprep.subr.mxu0 %v3008_v0 }
  0x59   :  { %2461 = vmatpush3.msra.mxu1 %v3173_v32  ;;  %2462 = vmatprep.mubr.msk.f32.mxu1 %vm3009_vm0, %v3008_v0 }
  0x5a   :  { %2472 = vmatpush3.msra.mxu0 %v158_v27  ;;  %2463 = vmatmul.mubr.f32.vlgmr.msra.gmra.mxu1 %v126_v42  ;;  %v3421_v27 = vand.u32 4294901760, %v696_v22 }
  0x5b   :  { %2473 = vmatprep.subr.mxu0 %v3008_v0  ;;  %2500 = vmatprep.subr.mxu1 %v3008_v0 }
  0x5c   :  { %2474 = vmatpush3.msra.mxu0 %v165_v29  ;;  %2501 = vmatpush3.msra.mxu1 %v3035_v4  ;;  %v701_v4 = vld [vmem:[#allocation2 + $0xf8] sm:$0xff]  ;;  %v3426_v29 = vand.u32 4294901760, %v694_v24 }
  0x5d   :  { %2475 = vmatprep.subr.mxu0 %v3008_v0  ;;  %2502 = vmatprep.subr.mxu1 %v3008_v0 }
  0x5e   :  { %2476 = vmatpush3.msra.mxu0 %v172_v40  ;;  %2503 = vmatpush3.msra.mxu1 %v3037_v5  ;;  %v3401_v5 = vand.u32 4294901760, %v701_v4  ;;  %v3436_v40 = vsub.f32 %v698_v15, %v3416_v21  ;;  %v3450_v47 = vsub.f32 %v694_v24, %v3426_v29  ;;  %v3528_v15 = vsub.f32 %v690_v36, %v3518_v51 }
  0x5f   :  { %2477 = vmatprep.subr.mxu0 %v3008_v0  ;;  %2504 = vmatprep.subr.mxu1 %v3008_v0 }
  0x60   :  { %2478 = vmatpush3.msra.mxu0 %v179_v46  ;;  %2505 = vmatpush3.msra.mxu1 %v3039_v6  ;;  %v700_v6 = vld [vmem:[#allocation2 + $0xf0] sm:$0xff]  ;;  %v845_v31 = vand.u32 4294901760, %v3450_v47 }
  0x61   :  { %2479 = vmatprep.subr.mxu0 %v3008_v0  ;;  %2506 = vmatprep.subr.mxu1 %v3008_v0 }
  0x62   :  { %2480 = vmatpush3.msra.mxu0 %v186_v53  ;;  %2507 = vmatpush3.msra.mxu1 %v3041_v10  ;;  %v3404_v10 = vsub.f32 %v701_v4, %v3401_v5  ;;  %v846_v56 = vsub.f32 %v3450_v47, %v845_v31  ;;  %v689_v4 = vld [vmem:[#allocation2 + $0x98] sm:$0xff] }
  0x63   :  { %2481 = vmatprep.subr.mxu0 %v3008_v0  ;;  %2508 = vmatprep.subr.mxu1 %v3008_v0 }
  0x64   :  { %2482 = vmatpush3.msra.mxu0 %v193_v57  ;;  %2509 = vmatpush3.msra.mxu1 %v3043_v11  ;;  %v3406_v11 = vand.u32 4294901760, %v700_v6 }
  0x65   :  { %2483 = vmatprep.subr.mxu0 %v3008_v0  ;;  %2510 = vmatprep.subr.mxu1 %v3008_v0 }
  0x66   :  { %2484 = vmatpush3.msra.mxu0 %v200_v3  ;;  %2511 = vmatpush3.msra.mxu1 %v3045_v12  ;;  %v699_v12 = vld [vmem:[#allocation2 + $0xe8] sm:$0xff]  ;;  %v3412_v18 = vsub.f32 %v700_v6, %v3406_v11  ;;  %v860_v6 = vsub.f32 %v3507_v14, %v859_v41 }
  0x67   :  { %2485 = vmatprep.subr.mxu0 %v3008_v0  ;;  %2512 = vmatprep.subr.mxu1 %v3008_v0  ;;  %v3414_v20 = vand.u32 4294901760, %v699_v12 }
  0x68   :  { %2486 = vmatpush3.msra.mxu0 %v207_v19  ;;  %2513 = vmatpush3.msra.mxu1 %v3054_v17  ;;  %v796_v17 = vand.u32 4294901760, %v3404_v10  ;;  %v803_v34 = vand.u32 4294901760, %v3412_v18 }
  0x69   :  { %2487 = vmatprep.subr.mxu0 %v3008_v0  ;;  %2514 = vmatprep.subr.mxu1 %v3008_v0 }
  0x6a   :  { %2488 = vmatpush3.msra.mxu0 %v214_v37  ;;  %2515 = vmatpush3.msra.mxu1 %v3070_v25  ;;  %v3419_v25 = vand.u32 4294901760, %v697_v16  ;;  %v797_v30 = vsub.f32 %v3404_v10, %v796_v17  ;;  %v804_v55 = vsub.f32 %v3412_v18, %v803_v34 }
  0x6b   :  { %2489 = vmatprep.subr.mxu0 %v3008_v0  ;;  %2516 = vmatprep.subr.mxu1 %v3008_v0 }
  0x6c   :  { %2490 = vmatpush3.msra.mxu0 %v221_v44  ;;  %2517 = vmatpush3.msra.mxu1 %v3074_v28  ;;  %v3424_v28 = vand.u32 4294901760, %v695_v23  ;;  %v3440_v43 = vsub.f32 %v697_v16, %v3419_v25  ;;  %v798_v53 = vand.u32 4294901760, %v797_v30  ;;  %v805_v3 = vand.u32 4294901760, %v804_v55  ;;  %v687_v55 = vld [vmem:[#allocation2 + $0x88] sm:$0xff] }
  0x6d   :  { %2491 = vmatprep.subr.mxu0 %v3008_v0  ;;  %2518 = vmatprep.subr.mxu1 %v3008_v0  ;;  %v3530_v16 = vand.u32 4294901760, %v689_v4  ;;  %v873_v30 = vand.u32 4294901760, %v3528_v15 }
  0x6e   :  { %2492 = vmatpush3.msra.mxu0 %v228_v52  ;;  %2519 = vmatpush3.msra.mxu1 %v3094_v35  ;;  %v3433_v35 = vsub.f32 %v699_v12, %v3414_v20  ;;  %v3446_v46 = vsub.f32 %v695_v23, %v3424_v28  ;;  %v824_v61 = vand.u32 4294901760, %v3440_v43  ;;  %v866_v12 = vand.u32 4294901760, %v3516_v50 }
  0x6f   :  { %2493 = vmatprep.subr.mxu0 %v3008_v0  ;;  %2520 = vmatprep.subr.mxu1 %v3008_v0  ;;  %v861_v23 = vand.u32 4294901760, %v860_v6 }
  0x70   :  { %2494 = vmatpush3.msra.mxu0 %v235_v1  ;;  %2521 = vmatpush3.msra.mxu1 %v3109_v45  ;;  %v3443_v45 = vsub.f32 %v696_v22, %v3421_v27  ;;  %v810_v57 = vand.u32 4294901760, %v3433_v35  ;;  %v825_v26 = vsub.f32 %v3440_v43, %v824_v61  ;;  %v688_v22 = vld [vmem:[#allocation2 + $0x90] sm:$0xff]  ;;  %v867_v24 = vsub.f32 %v3516_v50, %v866_v12 }
  0x71   :  { %2495 = vmatprep.subr.mxu0 %v3008_v0  ;;  %2522 = vmatprep.subr.mxu1 %v3008_v0 }
  0x72   :  { %2496 = vmatpush3.msra.mxu0 %v242_v9  ;;  %2497 = vmatprep.mubr.msk.f32.mxu0 %vm3009_vm0, %v3008_v0  ;;  %v811_v8 = vsub.f32 %v3433_v35, %v810_v57  ;;  %v826_v44 = vand.u32 4294901760, %v825_v26  ;;  %v847_v9 = vand.u32 4294901760, %v846_v56  ;;  %v3551_v26 = vand.u32 4294901760, %v687_v55 }
  0x73   :  { %2523 = vmatpush3.msra.mxu1 %v3117_v48  ;;  %2498 = vmatmul.mubr.f32.vlgmr.msra.gmra.mxu0 %v3142_v62  ;;  %v693_v48 = vld [vmem:[#allocation2 + $0xb8] sm:$0xff] }
  0x74   :  { %2524 = vmatprep.subr.mxu1 %v3008_v0  ;;  %2532 = vmatprep.mubr.msk.f32.mxu1 %vm3009_vm0, %v3008_v0  ;;  %v3469_v19 = vand.u32 4294901760, %v693_v48 }
  0x75   :  { %2525 = vmatpush3.msra.mxu1 %v3137_v59  ;;  %2535 = vmatprep.subr.mxu0 %v3008_v0  ;;  %v817_v59 = vand.u32 4294901760, %v3436_v40 }
  0x76   :  { %2526 = vmatprep.subr.mxu1 %v3008_v0  ;;  %2567 = vmatprep.mubr.msk.f32.mxu0 %vm3009_vm0, %v3008_v0  ;;  %v3480_v42 = vsub.f32 %v693_v48, %v3469_v19  ;;  %v3540_v48 = vsub.f32 %v689_v4, %v3530_v16 }
  0x77   :  { %2527 = vmatpush3.msra.mxu1 %v3146_v63  ;;  %2536 = vmatpush3.msra.mxu0 %v3401_v5  ;;  %v838_v63 = vand.u32 4294901760, %v3446_v46 }
  0x78   :  { %2528 = vmatprep.subr.mxu1 %v3008_v0  ;;  %2537 = vmatprep.subr.mxu0 %v3008_v0  ;;  %v852_v52 = vand.u32 4294901760, %v3480_v42 }
  0x79   :  { %2529 = vmatpush3.msra.mxu1 %v3161_v13  ;;  %2538 = vmatpush3.msra.mxu0 %v3406_v11  ;;  %v818_v13 = vsub.f32 %v3436_v40, %v817_v59  ;;  %v839_v49 = vsub.f32 %v3446_v46, %v838_v63 }
  0x7a   :  { %2530 = vmatprep.subr.mxu1 %v3008_v0  ;;  %2539 = vmatprep.subr.mxu0 %v3008_v0  ;;  %v853_v1 = vsub.f32 %v3480_v42, %v852_v52 }
  0x7b   :  { %2531 = vmatpush3.msra.mxu1 %v3173_v32  ;;  %2540 = vmatpush3.msra.mxu0 %v3414_v20  ;;  %v812_v32 = vand.u32 4294901760, %v811_v8  ;;  %v819_v37 = vand.u32 4294901760, %v818_v13  ;;  %v840_v60 = vand.u32 4294901760, %v839_v49  ;;  %v874_v8 = vsub.f32 %v3528_v15, %v873_v30 }
  0x7c   :  { %2533 = vmatmul.mubr.f32.vlgmr.msra.gmra.mxu1 %v3142_v62  ;;  %2570 = vmatprep.subr.mxu1 %v3008_v0  ;;  %v831_v62 = vand.u32 4294901760, %v3443_v45  ;;  %v854_v39 = vand.u32 4294901760, %v853_v1  ;;  %v4122_v13 = vand.u32 4294901760, %v3540_v48  ;;  %v3563_v49 = vsub.f32 %v687_v55, %v3551_v26 }
  0x7d   :  { %2602 = vmatprep.mubr.msk.f32.mxu1 %vm3009_vm0, %v3008_v0  ;;  %2541 = vmatprep.subr.mxu0 %v3008_v0 }
  0x7e   :  { %2542 = vmatpush3.msra.mxu0 %v3416_v21  ;;  %2571 = vmatpush3.msra.mxu1 %v798_v53  ;;  %v832_v38 = vsub.f32 %v3443_v45, %v831_v62  ;;  %v3544_v53 = vand.u32 4294901760, %v688_v22 }
  0x7f   :  { %2543 = vmatprep.subr.mxu0 %v3008_v0  ;;  %2572 = vmatprep.subr.mxu1 %v3008_v0 }
  0x80   :  { %2544 = vmatpush3.msra.mxu0 %v3419_v25  ;;  %2573 = vmatpush3.msra.mxu1 %v805_v3  ;;  %v833_v54 = vand.u32 4294901760, %v832_v38  ;;  %v868_v3 = vand.u32 4294901760, %v867_v24  ;;  %v875_v38 = vand.u32 4294901760, %v874_v8 }
  0x81   :  { %2545 = vmatprep.subr.mxu0 %v3008_v0  ;;  %2574 = vmatprep.subr.mxu1 %v3008_v0 }
  0x82   :  { %2546 = vmatpush3.msra.mxu0 %v3421_v27  ;;  %2575 = vmatpush3.msra.mxu1 %v812_v32  ;;  %v3556_v32 = vsub.f32 %v688_v22, %v3544_v53 }
  0x83   :  { %2547 = vmatprep.subr.mxu0 %v3008_v0  ;;  %2576 = vmatprep.subr.mxu1 %v3008_v0 }
  0x84   :  { %2548 = vmatpush3.msra.mxu0 %v3424_v28  ;;  %2577 = vmatpush3.msra.mxu1 %v819_v37  ;;  %v686_v37 = vld [vmem:[#allocation2 + $0x80] sm:$0xff]  ;;  %v4121_v56 = vand.u32 4294901760, %v3556_v32 }
  0x85   :  { %2549 = vmatprep.subr.mxu0 %v3008_v0  ;;  %2578 = vmatprep.subr.mxu1 %v3008_v0 }
  0x86   :  { %2550 = vmatpush3.msra.mxu0 %v3426_v29  ;;  %2579 = vmatpush3.msra.mxu1 %v826_v44  ;;  %v881_v44 = vsub.f32 %v3540_v48, %v4122_v13  ;;  %v888_v7 = vsub.f32 %v3556_v32, %v4121_v56 }
  0x87   :  { %2551 = vmatprep.subr.mxu0 %v3008_v0  ;;  %2580 = vmatprep.subr.mxu1 %v3008_v0 }
  0x88   :  { %2552 = vmatpush3.msra.mxu0 %v3469_v19  ;;  %2581 = vmatpush3.msra.mxu1 %v833_v54  ;;  %v3565_v54 = vand.u32 4294901760, %v686_v37  ;;  %v882_v58 = vand.u32 4294901760, %v881_v44 }
  0x89   :  { %2553 = vmatprep.subr.mxu0 %v3008_v0  ;;  %2582 = vmatprep.subr.mxu1 %v3008_v0 }
  0x8a   :  { %2554 = vmatpush3.msra.mxu0 %v3501_v2  ;;  %2583 = vmatpush3.msra.mxu1 %v840_v60  ;;  %v4120_v60 = vand.u32 4294901760, %v3563_v49  ;;  %v3573_v1 = vsub.f32 %v686_v37, %v3565_v54 }
  0x8b   :  { %2555 = vmatprep.subr.mxu0 %v3008_v0  ;;  %2584 = vmatprep.subr.mxu1 %v3008_v0 }
  0x8c   :  { %2556 = vmatpush3.msra.mxu0 %v3509_v33  ;;  %2585 = vmatpush3.msra.mxu1 %v847_v9  ;;  %v895_v9 = vsub.f32 %v3563_v49, %v4120_v60  ;;  %v4119_v36 = vand.u32 4294901760, %v3573_v1 }
  0x8d   :  { %2557 = vmatprep.subr.mxu0 %v3008_v0  ;;  %2586 = vmatprep.subr.mxu1 %v3008_v0 }
  0x8e   :  { %2558 = vmatpush3.msra.mxu0 %v3518_v51  ;;  %2587 = vmatpush3.msra.mxu1 %v854_v39  ;;  %v889_v39 = vand.u32 4294901760, %v888_v7  ;;  %v896_v4 = vand.u32 4294901760, %v895_v9  ;;  %v902_v6 = vsub.f32 %v3573_v1, %v4119_v36 }
  0x8f   :  { %2559 = vmatprep.subr.mxu0 %v3008_v0  ;;  %2588 = vmatprep.subr.mxu1 %v3008_v0 }
  0x90   :  { %2560 = vmatpush3.msra.mxu0 %v3530_v16  ;;  %2589 = vmatpush3.msra.mxu1 %v861_v23  ;;  %v903_v22 = vand.u32 4294901760, %v902_v6 }
  0x91   :  { %2561 = vmatprep.subr.mxu0 %v3008_v0  ;;  %2590 = vmatprep.subr.mxu1 %v3008_v0 }
  0x92   :  { %2562 = vmatpush3.msra.mxu0 %v3544_v53  ;;  %2591 = vmatpush3.msra.mxu1 %v868_v3 }
  0x93   :  { %2563 = vmatprep.subr.mxu0 %v3008_v0  ;;  %2592 = vmatprep.subr.mxu1 %v3008_v0 }
  0x94   :  { %2564 = vmatpush3.msra.mxu0 %v3551_v26  ;;  %2593 = vmatpush3.msra.mxu1 %v875_v38 }
  0x95   :  { %2565 = vmatprep.subr.mxu0 %v3008_v0  ;;  %2594 = vmatprep.subr.mxu1 %v3008_v0 }
  0x96   :  { %2566 = vmatpush3.msra.mxu0 %v3565_v54  ;;  %2595 = vmatpush3.msra.mxu1 %v882_v58 }
  0x97   :  { %2605 = vmatprep.subr.mxu0 %v3008_v0  ;;  %2596 = vmatprep.subr.mxu1 %v3008_v0 }
  0x98   :  { %2597 = vmatpush3.msra.mxu1 %v889_v39 }
  0x99   :  { %2598 = vmatprep.subr.mxu1 %v3008_v0 }
  0x9a   :  { %2599 = vmatpush3.msra.mxu1 %v896_v4 }
  0x9b   :  { %2600 = vmatprep.subr.mxu1 %v3008_v0 }
  0x9c   :  { %2601 = vmatpush3.msra.mxu1 %v903_v22 }
  0x9d   :  { %2640 = vmatprep.subr.mxu1 %v3008_v0 }
  0xf1   :  { %v130_v23 = vpop.f32.mrf.mxu0 }
  0xf3   :  { %v2359_v24 = vpop.f32.mrf.mxu0 }
  0xf8   :  { %v281_v55 = vpop.f32.mrf.mxu1 }
  0xf9   :  { %v282_v7 = vadd.f32 %v281_v55, %v130_v23 }
  0xfa   :  { %v2394_v3 = vpop.f32.mrf.mxu1 }
 0x111   :  { %v385_v8 = vpop.f32.mrf.mxu0 }
 0x112   :  { %v386_v39 = vadd.f32 %v385_v8, %v282_v7  ;;  %v1352_v8 = vld [vmem:[#allocation2 + $0x138] sm:$0xff] }
 0x113   :  { %v2429_v37 = vpop.f32.mrf.mxu0 }
 0x11a   :  { %v474_v38 = vpop.f32.mrf.mxu1 }
 0x11b   :  { %v475_v36 = vadd.f32 %v474_v38, %v386_v39 }
 0x11c   :  { %v2464_v44 = vpop.f32.mrf.mxu1 }
 0x11d   :  { %v3849_v44 = vand.u32 4294901760, %v1352_v8 }
 0x133   :  { %v593_v58 = vpop.f32.mrf.mxu0 }
 0x134   :  { %v594_v6 = vadd.f32 %v593_v58, %v475_v36  ;;  %v1351_v58 = vld [vmem:[#allocation2 + $0x130] sm:$0xff] }
 0x135   :  { %v2499_v9 = vpop.f32.mrf.mxu0  ;;  %v3857_v39 = vand.u32 4294901760, %v1351_v58 }
 0x136   :  { %v3855_v9 = vsub.f32 %v1352_v8, %v3849_v44 }
 0x13c   :  { %v680_v4 = vpop.f32.mrf.mxu1 }
 0x13d   :  { %v681_v60 = vadd.f32 %v680_v4, %v594_v6  ;;  %v1350_v6 = vld [vmem:[#allocation2 + $0x128] sm:$0xff] }
 0x13e   :  { %v2534_v56 = vpop.f32.mrf.mxu1 }
 0x13f   :  { %v684_v22 = vmax.f32 %v681_v60, 0.0 }
 0x141   :  { %v3593_v13 = vand.u32 4294901760, %v684_v22 }
 0x143   :  { %v3596_v24 = vsub.f32 %v684_v22, %v3593_v13  ;;  %2603 = vmatmul.mubr.f32.vlgmr.msra.gmra.mxu1 %v3593_v13  ;;  %v1511_v22 = vand.u32 4294901760, %v3855_v9 }
 0x144   :  { %2641 = vmatpush3.msra.mxu1 %v3401_v5  ;;  %2672 = vmatprep.mubr.msk.f32.mxu1 %vm3009_vm0, %v3008_v0 }
 0x145   :  { %v785_v23 = vand.u32 4294901760, %v3596_v24  ;;  %2642 = vmatprep.subr.mxu1 %v3008_v0 }
 0x146   :  { %2643 = vmatpush3.msra.mxu1 %v3406_v11 }
 0x147   :  { %v786_v56 = vsub.f32 %v3596_v24, %v785_v23  ;;  %2644 = vmatprep.subr.mxu1 %v3008_v0 }
 0x148   :  { %2645 = vmatpush3.msra.mxu1 %v3414_v20 }
 0x149   :  { %2646 = vmatprep.subr.mxu1 %v3008_v0  ;;  %v787_v60 = vand.u32 4294901760, %v786_v56  ;;  %v1349_v56 = vld [vmem:[#allocation2 + $0x120] sm:$0xff] }
 0x14a   :  { %2647 = vmatpush3.msra.mxu1 %v3416_v21 }
 0x14b   :  { %2648 = vmatprep.subr.mxu1 %v3008_v0  ;;  %2568 = vmatmul.mubr.f32.vlgmr.msra.gmra.mxu0 %v787_v60  ;;  %v1512_v60 = vsub.f32 %v3855_v9, %v1511_v22 }
 0x14c   :  { %2606 = vmatpush3.msra.mxu0 %v3404_v10  ;;  %2649 = vmatpush3.msra.mxu1 %v3419_v25  ;;  %v4128_v10 = vand.u32 4294901760, %v3556_v32 }
 0x14d   :  { %2607 = vmatprep.subr.mxu0 %v3008_v0  ;;  %2650 = vmatprep.subr.mxu1 %v3008_v0 }
 0x14e   :  { %2608 = vmatpush3.msra.mxu0 %v3412_v18  ;;  %2651 = vmatpush3.msra.mxu1 %v3421_v27  ;;  %v1360_v18 = vld [vmem:[#allocation2 + $0x178] sm:$0xff] }
 0x14f   :  { %2609 = vmatprep.subr.mxu0 %v3008_v0  ;;  %2652 = vmatprep.subr.mxu1 %v3008_v0 }
 0x150   :  { %2610 = vmatpush3.msra.mxu0 %v3433_v35  ;;  %2653 = vmatpush3.msra.mxu1 %v3424_v28 }
 0x151   :  { %2611 = vmatprep.subr.mxu0 %v3008_v0  ;;  %2654 = vmatprep.subr.mxu1 %v3008_v0 }
 0x152   :  { %2612 = vmatpush3.msra.mxu0 %v3436_v40  ;;  %2655 = vmatpush3.msra.mxu1 %v3426_v29 }
 0x153   :  { %2613 = vmatprep.subr.mxu0 %v3008_v0  ;;  %2656 = vmatprep.subr.mxu1 %v3008_v0 }
 0x154   :  { %2614 = vmatpush3.msra.mxu0 %v3440_v43  ;;  %2657 = vmatpush3.msra.mxu1 %v3469_v19 }
 0x155   :  { %2615 = vmatprep.subr.mxu0 %v3008_v0  ;;  %2658 = vmatprep.subr.mxu1 %v3008_v0 }
 0x156   :  { %2616 = vmatpush3.msra.mxu0 %v3443_v45  ;;  %2659 = vmatpush3.msra.mxu1 %v3501_v2  ;;  %v1355_v45 = vld [vmem:[#allocation2 + $0x150] sm:$0xff] }
 0x157   :  { %2617 = vmatprep.subr.mxu0 %v3008_v0  ;;  %2660 = vmatprep.subr.mxu1 %v3008_v0 }
 0x158   :  { %2618 = vmatpush3.msra.mxu0 %v3446_v46  ;;  %2661 = vmatpush3.msra.mxu1 %v3509_v33  ;;  %v1354_v46 = vld [vmem:[#allocation2 + $0x148] sm:$0xff] }
 0x159   :  { %2619 = vmatprep.subr.mxu0 %v3008_v0  ;;  %2662 = vmatprep.subr.mxu1 %v3008_v0 }
 0x15a   :  { %2620 = vmatpush3.msra.mxu0 %v3450_v47  ;;  %2663 = vmatpush3.msra.mxu1 %v3518_v51  ;;  %v1353_v47 = vld [vmem:[#allocation2 + $0x140] sm:$0xff] }
 0x15b   :  { %2621 = vmatprep.subr.mxu0 %v3008_v0  ;;  %2664 = vmatprep.subr.mxu1 %v3008_v0 }
 0x15c   :  { %2622 = vmatpush3.msra.mxu0 %v3480_v42  ;;  %2665 = vmatpush3.msra.mxu1 %v3530_v16  ;;  %v3794_v42 = vand.u32 4294901760, %v1353_v47 }
 0x15d   :  { %2623 = vmatprep.subr.mxu0 %v3008_v0  ;;  %2666 = vmatprep.subr.mxu1 %v3008_v0 }
 0x15e   :  { %2624 = vmatpush3.msra.mxu0 %v3507_v14  ;;  %2667 = vmatpush3.msra.mxu1 %v3544_v53 }
 0x15f   :  { %2625 = vmatprep.subr.mxu0 %v3008_v0  ;;  %2668 = vmatprep.subr.mxu1 %v3008_v0 }
 0x160   :  { %2626 = vmatpush3.msra.mxu0 %v3516_v50  ;;  %2669 = vmatpush3.msra.mxu1 %v3551_v26 }
 0x161   :  { %2627 = vmatprep.subr.mxu0 %v3008_v0  ;;  %2670 = vmatprep.subr.mxu1 %v3008_v0 }
 0x162   :  { %2628 = vmatpush3.msra.mxu0 %v3528_v15  ;;  %2671 = vmatpush3.msra.mxu1 %v3565_v54 }
 0x163   :  { %2629 = vmatprep.subr.mxu0 %v3008_v0  ;;  %2673 = vmatmul.mubr.f32.vlgmr.msra.gmra.mxu1 %v785_v23  ;;  %v3866_v23 = vand.u32 4294901760, %v1350_v6 }
 0x164   :  { %2710 = vmatprep.subr.mxu1 %v3008_v0  ;;  %2630 = vmatpush3.msra.mxu0 %v3540_v48 }
 0x165   :  { %2711 = vmatpush3.msra.mxu1 %v3401_v5  ;;  %2631 = vmatprep.subr.mxu0 %v3008_v0  ;;  %v4127_v5 = vand.u32 4294901760, %v3540_v48 }
 0x166   :  { %2712 = vmatprep.subr.mxu1 %v3008_v0  ;;  %2632 = vmatpush3.msra.mxu0 %v3556_v32 }
 0x167   :  { %2713 = vmatpush3.msra.mxu1 %v3406_v11  ;;  %2633 = vmatprep.subr.mxu0 %v3008_v0  ;;  %v4129_v11 = vand.u32 4294901760, %v3563_v49 }
 0x168   :  { %2714 = vmatprep.subr.mxu1 %v3008_v0  ;;  %2634 = vmatpush3.msra.mxu0 %v3563_v49 }
 0x169   :  { %2715 = vmatpush3.msra.mxu1 %v3414_v20  ;;  %2635 = vmatprep.subr.mxu0 %v3008_v0  ;;  %v3760_v20 = vand.u32 4294901760, %v1360_v18 }
 0x16a   :  { %2716 = vmatprep.subr.mxu1 %v3008_v0  ;;  %2636 = vmatpush3.msra.mxu0 %v3573_v1 }
 0x16b   :  { %2637 = vmatprep.mubr.msk.f32.mxu0 %vm3009_vm0, %v3008_v0  ;;  %2717 = vmatpush3.msra.mxu1 %v3416_v21  ;;  %v1359_v21 = vld [vmem:[#allocation2 + $0x170] sm:$0xff] }
 0x16c   :  { %2638 = vmatmul.mubr.f32.vlgmr.msra.gmra.mxu0 %v3596_v24  ;;  %2675 = vmatprep.subr.mxu0 %v3008_v0  ;;  %v3864_v24 = vsub.f32 %v1351_v58, %v3857_v39 }
 0x16d   :  { %2718 = vmatprep.subr.mxu1 %v3008_v0  ;;  %2676 = vmatpush3.msra.mxu0 %v796_v17  ;;  %v4130_v17 = vand.u32 4294901760, %v3573_v1 }
 0x16e   :  { %2719 = vmatpush3.msra.mxu1 %v3419_v25  ;;  %2677 = vmatprep.subr.mxu0 %v3008_v0  ;;  %v3763_v25 = vsub.f32 %v1360_v18, %v3760_v20  ;;  %v1513_v18 = vand.u32 4294901760, %v1512_v60 }
 0x16f   :  { %2720 = vmatprep.subr.mxu1 %v3008_v0  ;;  %2678 = vmatpush3.msra.mxu0 %v803_v34  ;;  %v1356_v34 = vld [vmem:[#allocation2 + $0x158] sm:$0xff] }
 0x170   :  { %2721 = vmatpush3.msra.mxu1 %v3421_v27  ;;  %2679 = vmatprep.subr.mxu0 %v3008_v0  ;;  %v3765_v27 = vand.u32 4294901760, %v1359_v21  ;;  %v3772_v43 = vand.u32 4294901760, %v1356_v34 }
 0x171   :  { %2722 = vmatprep.subr.mxu1 %v3008_v0  ;;  %2680 = vmatpush3.msra.mxu0 %v810_v57  ;;  %v1455_v57 = vand.u32 4294901760, %v3763_v25 }
 0x172   :  { %2723 = vmatpush3.msra.mxu1 %v3424_v28  ;;  %2681 = vmatprep.subr.mxu0 %v3008_v0  ;;  %v1358_v28 = vld [vmem:[#allocation2 + $0x168] sm:$0xff] }
 0x173   :  { %2724 = vmatprep.subr.mxu1 %v3008_v0  ;;  %2682 = vmatpush3.msra.mxu0 %v817_v59  ;;  %v3768_v35 = vand.u32 4294901760, %v1358_v28  ;;  %v3777_v59 = vsub.f32 %v1359_v21, %v3765_v27 }
 0x174   :  { %2725 = vmatpush3.msra.mxu1 %v3426_v29  ;;  %2683 = vmatprep.subr.mxu0 %v3008_v0  ;;  %v1357_v29 = vld [vmem:[#allocation2 + $0x160] sm:$0xff] }
 0x175   :  { %2726 = vmatprep.subr.mxu1 %v3008_v0  ;;  %2684 = vmatpush3.msra.mxu0 %v824_v61  ;;  %v3770_v40 = vand.u32 4294901760, %v1357_v29  ;;  %v3780_v61 = vand.u32 4294901760, %v1355_v45 }
 0x176   :  { %2727 = vmatpush3.msra.mxu1 %v3469_v19  ;;  %2685 = vmatprep.subr.mxu0 %v3008_v0 }
 0x177   :  { %2728 = vmatprep.subr.mxu1 %v3008_v0  ;;  %2686 = vmatpush3.msra.mxu0 %v831_v62  ;;  %v3782_v62 = vand.u32 4294901760, %v1354_v46  ;;  %v3788_v19 = vsub.f32 %v1357_v29, %v3770_v40  ;;  %v3801_v14 = vsub.f32 %v1355_v45, %v3780_v61  ;;  %v1347_v45 = vld [vmem:[#allocation2 + $0x110] sm:$0xff] }
 0x178   :  { %2729 = vmatpush3.msra.mxu1 %v3501_v2  ;;  %2687 = vmatprep.subr.mxu0 %v3008_v0  ;;  %v1462_v2 = vand.u32 4294901760, %v3777_v59 }
 0x179   :  { %2730 = vmatprep.subr.mxu1 %v3008_v0  ;;  %2688 = vmatpush3.msra.mxu0 %v838_v63  ;;  %v3785_v63 = vsub.f32 %v1358_v28, %v3768_v35  ;;  %v1476_v50 = vand.u32 4294901760, %v3788_v19 }
 0x17a   :  { %2731 = vmatpush3.msra.mxu1 %v3509_v33  ;;  %2689 = vmatprep.subr.mxu0 %v3008_v0  ;;  %v3805_v33 = vsub.f32 %v1354_v46, %v3782_v62  ;;  %v1463_v15 = vsub.f32 %v3777_v59, %v1462_v2 }
 0x17b   :  { %2732 = vmatprep.subr.mxu1 %v3008_v0  ;;  %2690 = vmatpush3.msra.mxu0 %v845_v31  ;;  %v3791_v31 = vsub.f32 %v1356_v34, %v3772_v43 }
 0x17c   :  { %2733 = vmatpush3.msra.mxu1 %v3518_v51  ;;  %2691 = vmatprep.subr.mxu0 %v3008_v0  ;;  %v1497_v32 = vand.u32 4294901760, %v3805_v33 }
 0x17d   :  { %2734 = vmatprep.subr.mxu1 %v3008_v0  ;;  %2692 = vmatpush3.msra.mxu0 %v852_v52  ;;  %v1456_v52 = vsub.f32 %v3763_v25, %v1455_v57  ;;  %v1483_v51 = vand.u32 4294901760, %v3791_v31 }
 0x17e   :  { %2735 = vmatpush3.msra.mxu1 %v3530_v16  ;;  %2693 = vmatprep.subr.mxu0 %v3008_v0  ;;  %v1490_v16 = vand.u32 4294901760, %v3801_v14  ;;  %v1498_v3 = vsub.f32 %v3805_v33, %v1497_v32 }
 0x17f   :  { %2736 = vmatprep.subr.mxu1 %v3008_v0  ;;  %2694 = vmatpush3.msra.mxu0 %v859_v41  ;;  %v1469_v41 = vand.u32 4294901760, %v3785_v63 }
 0x180   :  { %2737 = vmatpush3.msra.mxu1 %v3544_v53  ;;  %2695 = vmatprep.subr.mxu0 %v3008_v0  ;;  %v1477_v53 = vsub.f32 %v3788_v19, %v1476_v50  ;;  %v1491_v1 = vsub.f32 %v3801_v14, %v1490_v16  ;;  %v1499_v7 = vand.u32 4294901760, %v1498_v3 }
 0x181   :  { %2738 = vmatprep.subr.mxu1 %v3008_v0  ;;  %2696 = vmatpush3.msra.mxu0 %v866_v12  ;;  %v1457_v12 = vand.u32 4294901760, %v1456_v52  ;;  %v1470_v48 = vsub.f32 %v3785_v63, %v1469_v41 }
 0x182   :  { %2739 = vmatpush3.msra.mxu1 %v3551_v26  ;;  %2697 = vmatprep.subr.mxu0 %v3008_v0  ;;  %v1484_v26 = vsub.f32 %v3791_v31, %v1483_v51  ;;  %v1492_v37 = vand.u32 4294901760, %v1491_v1  ;;  %v1345_v1 = vld [vmem:[#allocation2 + $0x100] sm:$0xff] }
 0x183   :  { %2740 = vmatprep.subr.mxu1 %v3008_v0  ;;  %2698 = vmatpush3.msra.mxu0 %v873_v30  ;;  %v3817_v30 = vsub.f32 %v1353_v47, %v3794_v42  ;;  %v1471_v49 = vand.u32 4294901760, %v1470_v48  ;;  %v1346_v48 = vld [vmem:[#allocation2 + $0x108] sm:$0xff] }
 0x184   :  { %2741 = vmatpush3.msra.mxu1 %v3565_v54  ;;  %2742 = vmatprep.mubr.msk.f32.mxu1 %vm3009_vm0, %v3008_v0  ;;  %v1478_v54 = vand.u32 4294901760, %v1477_v53  ;;  %v1485_v55 = vand.u32 4294901760, %v1484_v26 }
 0x185   :  { %2699 = vmatprep.subr.mxu0 %v3008_v0  ;;  %2743 = vmatmul.mubr.f32.vlgmr.msra.gmra.mxu1 %v3593_v13  ;;  %v1504_v36 = vand.u32 4294901760, %v3817_v30 }
 0x186   :  { %2700 = vmatpush3.msra.mxu0 %v4127_v5  ;;  %2707 = vmatprep.mubr.msk.f32.mxu0 %vm3009_vm0, %v3008_v0  ;;  %v1518_v5 = vand.u32 4294901760, %v3864_v24 }
 0x187   :  { %2701 = vmatprep.subr.mxu0 %v3008_v0  ;;  %2780 = vmatprep.subr.mxu1 %v3008_v0  ;;  %v1505_v38 = vsub.f32 %v3817_v30, %v1504_v36 }
 0x188   :  { %2702 = vmatpush3.msra.mxu0 %v4128_v10  ;;  %2812 = vmatprep.mubr.msk.f32.mxu1 %vm3009_vm0, %v3008_v0  ;;  %v3876_v10 = vsub.f32 %v1350_v6, %v3866_v23  ;;  %v1519_v21 = vsub.f32 %v3864_v24, %v1518_v5 }
 0x189   :  { %2703 = vmatprep.subr.mxu0 %v3008_v0  ;;  %2781 = vmatpush3.msra.mxu1 %v1457_v12  ;;  %v1506_v4 = vand.u32 4294901760, %v1505_v38  ;;  %v3899_v12 = vand.u32 4294901760, %v1347_v45 }
 0x18a   :  { %2704 = vmatpush3.msra.mxu0 %v4129_v11  ;;  %2782 = vmatprep.subr.mxu1 %v3008_v0  ;;  %v3878_v11 = vand.u32 4294901760, %v1349_v56  ;;  %v1525_v28 = vand.u32 4294901760, %v3876_v10  ;;  %v1520_v46 = vand.u32 4294901760, %v1519_v21 }
 0x18b   :  { %2705 = vmatprep.subr.mxu0 %v3008_v0  ;;  %v3910_v26 = vsub.f32 %v1347_v45, %v3899_v12 }
 0x18c   :  { %2706 = vmatpush3.msra.mxu0 %v4130_v17  ;;  %v1348_v17 = vld [vmem:[#allocation2 + $0x118] sm:$0xff]  ;;  %v3888_v29 = vsub.f32 %v1349_v56, %v3878_v11  ;;  %v1526_v47 = vsub.f32 %v3876_v10, %v1525_v28 }
 0x18d   :  { %2708 = vmatmul.mubr.f32.vlgmr.msra.gmra.mxu0 %v3593_v13  ;;  %2745 = vmatprep.subr.mxu0 %v3008_v0  ;;  %v1464_v13 = vand.u32 4294901760, %v1463_v15  ;;  %v3892_v34 = vand.u32 4294901760, %v1348_v17  ;;  %v4125_v3 = vand.u32 4294901760, %v3910_v26 }
 0x18e   :  { %2777 = vmatprep.mubr.msk.f32.mxu0 %vm3009_vm0, %v3008_v0  ;;  %2746 = vmatpush3.msra.mxu0 %v3760_v20  ;;  %v1532_v52 = vand.u32 4294901760, %v3888_v29  ;;  %v1527_v53 = vand.u32 4294901760, %v1526_v47 }
 0x18f   :  { %2747 = vmatprep.subr.mxu0 %v3008_v0  ;;  %2783 = vmatpush3.msra.mxu1 %v1464_v13  ;;  %v3903_v15 = vsub.f32 %v1348_v17, %v3892_v34  ;;  %v1547_v58 = vsub.f32 %v3910_v26, %v4125_v3 }
 0x190   :  { %2748 = vmatpush3.msra.mxu0 %v3765_v27  ;;  %2784 = vmatprep.subr.mxu1 %v3008_v0  ;;  %v1533_v13 = vsub.f32 %v3888_v29, %v1532_v52 }
 0x191   :  { %2749 = vmatprep.subr.mxu0 %v3008_v0  ;;  %2785 = vmatpush3.msra.mxu1 %v1471_v49  ;;  %v3912_v49 = vand.u32 4294901760, %v1346_v48  ;;  %v1548_v56 = vand.u32 4294901760, %v1547_v58 }
 0x192   :  { %2750 = vmatpush3.msra.mxu0 %v3768_v35  ;;  %2786 = vmatprep.subr.mxu1 %v3008_v0 }
 0x193   :  { %2751 = vmatprep.subr.mxu0 %v3008_v0  ;;  %2787 = vmatpush3.msra.mxu1 %v1478_v54  ;;  %v4126_v54 = vand.u32 4294901760, %v3903_v15  ;;  %v3920_v8 = vsub.f32 %v1346_v48, %v3912_v49 }
 0x194   :  { %2752 = vmatpush3.msra.mxu0 %v3770_v40  ;;  %2788 = vmatprep.subr.mxu1 %v3008_v0 }
 0x195   :  { %2753 = vmatprep.subr.mxu0 %v3008_v0  ;;  %2789 = vmatpush3.msra.mxu1 %v1485_v55  ;;  %v1534_v55 = vand.u32 4294901760, %v1533_v13  ;;  %v1540_v38 = vsub.f32 %v3903_v15, %v4126_v54 }
 0x196   :  { %2754 = vmatpush3.msra.mxu0 %v3772_v43  ;;  %2790 = vmatprep.subr.mxu1 %v3008_v0 }
 0x197   :  { %2755 = vmatprep.subr.mxu0 %v3008_v0  ;;  %2791 = vmatpush3.msra.mxu1 %v1492_v37  ;;  %v3922_v37 = vand.u32 4294901760, %v1345_v1 }
 0x198   :  { %2756 = vmatpush3.msra.mxu0 %v3780_v61  ;;  %2792 = vmatprep.subr.mxu1 %v3008_v0 }
 0x199   :  { %2757 = vmatprep.subr.mxu0 %v3008_v0  ;;  %2793 = vmatpush3.msra.mxu1 %v1499_v7  ;;  %v4124_v7 = vand.u32 4294901760, %v3920_v8  ;;  %v3935_v6 = vsub.f32 %v1345_v1, %v3922_v37 }
 0x19a   :  { %2758 = vmatpush3.msra.mxu0 %v3782_v62  ;;  %2794 = vmatprep.subr.mxu1 %v3008_v0 }
 0x19b   :  { %2759 = vmatprep.subr.mxu0 %v3008_v0  ;;  %2795 = vmatpush3.msra.mxu1 %v1506_v4  ;;  %v1541_v4 = vand.u32 4294901760, %v1540_v38  ;;  %v1554_v60 = vsub.f32 %v3920_v8, %v4124_v7  ;;  %v4123_v17 = vand.u32 4294901760, %v3935_v6 }
 0x19c   :  { %2760 = vmatpush3.msra.mxu0 %v3794_v42  ;;  %2796 = vmatprep.subr.mxu1 %v3008_v0 }
 0x19d   :  { %2761 = vmatprep.subr.mxu0 %v3008_v0  ;;  %2797 = vmatpush3.msra.mxu1 %v1513_v18  ;;  %v1555_v18 = vand.u32 4294901760, %v1554_v60  ;;  %v1561_v21 = vsub.f32 %v3935_v6, %v4123_v17 }
 0x19e   :  { %2762 = vmatpush3.msra.mxu0 %v3849_v44  ;;  %2798 = vmatprep.subr.mxu1 %v3008_v0 }
 0x19f   :  { %2763 = vmatprep.subr.mxu0 %v3008_v0  ;;  %2799 = vmatpush3.msra.mxu1 %v1520_v46  ;;  %v1562_v45 = vand.u32 4294901760, %v1561_v21 }
 0x1a0   :  { %2764 = vmatpush3.msra.mxu0 %v3857_v39  ;;  %2800 = vmatprep.subr.mxu1 %v3008_v0 }
 0x1a1   :  { %2765 = vmatprep.subr.mxu0 %v3008_v0  ;;  %2801 = vmatpush3.msra.mxu1 %v1527_v53 }
 0x1a2   :  { %2766 = vmatpush3.msra.mxu0 %v3866_v23  ;;  %2802 = vmatprep.subr.mxu1 %v3008_v0 }
 0x1a3   :  { %2767 = vmatprep.subr.mxu0 %v3008_v0  ;;  %2803 = vmatpush3.msra.mxu1 %v1534_v55 }
 0x1a4   :  { %2768 = vmatpush3.msra.mxu0 %v3878_v11  ;;  %2804 = vmatprep.subr.mxu1 %v3008_v0 }
 0x1a5   :  { %2769 = vmatprep.subr.mxu0 %v3008_v0  ;;  %2805 = vmatpush3.msra.mxu1 %v1541_v4 }
 0x1a6   :  { %2770 = vmatpush3.msra.mxu0 %v3892_v34  ;;  %2806 = vmatprep.subr.mxu1 %v3008_v0 }
 0x1a7   :  { %2771 = vmatprep.subr.mxu0 %v3008_v0  ;;  %2807 = vmatpush3.msra.mxu1 %v1548_v56 }
 0x1a8   :  { %2772 = vmatpush3.msra.mxu0 %v3899_v12  ;;  %2808 = vmatprep.subr.mxu1 %v3008_v0 }
 0x1a9   :  { %2773 = vmatprep.subr.mxu0 %v3008_v0  ;;  %2809 = vmatpush3.msra.mxu1 %v1555_v18 }
 0x1aa   :  { %2774 = vmatpush3.msra.mxu0 %v3912_v49  ;;  %2810 = vmatprep.subr.mxu1 %v3008_v0 }
 0x1ab   :  { %2775 = vmatprep.subr.mxu0 %v3008_v0  ;;  %2811 = vmatpush3.msra.mxu1 %v1562_v45 }
 0x1ac   :  { %2776 = vmatpush3.msra.mxu0 %v3922_v37  ;;  %2850 = vmatprep.subr.mxu1 %v3008_v0 }
 0x1ad   :  { %2815 = vmatprep.subr.mxu0 %v3008_v0 }
 0x203   :  { %v940_v46 = vpop.f32.mrf.mxu1 }
 0x205   :  { %v2604_v47 = vpop.f32.mrf.mxu1 }
 0x20b   :  { %v789_v48 = vpop.f32.mrf.mxu0 }
 0x20c   :  { %v941_v4 = vadd.f32 %v940_v46, %v789_v48 }
 0x20d   :  { %v2569_v53 = vpop.f32.mrf.mxu0 }
 0x223   :  { %v1133_v13 = vpop.f32.mrf.mxu1 }
 0x225   :  { %v2674_v1 = vpop.f32.mrf.mxu1 }
 0x22c   :  { %v1044_v55 = vpop.f32.mrf.mxu0 }
 0x22d   :  { %v1045_v60 = vadd.f32 %v1044_v55, %v941_v4 }
 0x22e   :  { %v2639_v38 = vpop.f32.mrf.mxu0 }
 0x22f   :  { %v1134_v17 = vadd.f32 %v1133_v13, %v1045_v60 }
 0x245   :  { %v1339_v58 = vpop.f32.mrf.mxu1 }
 0x247   :  { %v2744_v56 = vpop.f32.mrf.mxu1 }
 0x24d   :  { %v1252_v21 = vpop.f32.mrf.mxu0 }
 0x24e   :  { %v1253_v18 = vadd.f32 %v1252_v21, %v1134_v17 }
 0x24f   :  { %v2709_v7 = vpop.f32.mrf.mxu0 }
 0x250   :  { %v1340_v3 = vadd.f32 %v1339_v58, %v1253_v18 }
 0x252   :  { %v1343_v45 = vmax.f32 %v1340_v3, 0.0 }
 0x254   :  { %v3952_v54 = vand.u32 4294901760, %v1343_v45 }
 0x256   :  { %v3955_v47 = vsub.f32 %v1343_v45, %v3952_v54  ;;  %2813 = vmatmul.mubr.f32.vlgmr.msra.gmra.mxu1 %v3952_v54 }
 0x257   :  { %2851 = vmatpush3.msra.mxu1 %v3760_v20  ;;  %2882 = vmatprep.mubr.msk.f32.mxu1 %vm3009_vm0, %v3008_v0 }
 0x258   :  { %v1444_v46 = vand.u32 4294901760, %v3955_v47  ;;  %2852 = vmatprep.subr.mxu1 %v3008_v0 }
 0x259   :  { %2853 = vmatpush3.msra.mxu1 %v3765_v27 }
 0x25a   :  { %2854 = vmatprep.subr.mxu1 %v3008_v0  ;;  %v1445_v3 = vsub.f32 %v3955_v47, %v1444_v46 }
 0x25b   :  { %2855 = vmatpush3.msra.mxu1 %v3768_v35 }
 0x25c   :  { %2856 = vmatprep.subr.mxu1 %v3008_v0  ;;  %v1446_v7 = vand.u32 4294901760, %v1445_v3 }
 0x25d   :  { %2857 = vmatpush3.msra.mxu1 %v3770_v40 }
 0x25e   :  { %2858 = vmatprep.subr.mxu1 %v3008_v0  ;;  %2778 = vmatmul.mubr.f32.vlgmr.msra.gmra.mxu0 %v1446_v7 }
 0x25f   :  { %2816 = vmatpush3.msra.mxu0 %v3763_v25  ;;  %2859 = vmatpush3.msra.mxu1 %v3772_v43  ;;  %v4132_v25 = vand.u32 4294901760, %v3910_v26 }
 0x260   :  { %2817 = vmatprep.subr.mxu0 %v3008_v0  ;;  %2860 = vmatprep.subr.mxu1 %v3008_v0 }
 0x261   :  { %2818 = vmatpush3.msra.mxu0 %v3777_v59  ;;  %2861 = vmatpush3.msra.mxu1 %v3780_v61 }
 0x262   :  { %2819 = vmatprep.subr.mxu0 %v3008_v0  ;;  %2862 = vmatprep.subr.mxu1 %v3008_v0 }
 0x263   :  { %2820 = vmatpush3.msra.mxu0 %v3785_v63  ;;  %2863 = vmatpush3.msra.mxu1 %v3782_v62 }
 0x264   :  { %2821 = vmatprep.subr.mxu0 %v3008_v0  ;;  %2864 = vmatprep.subr.mxu1 %v3008_v0 }
 0x265   :  { %2822 = vmatpush3.msra.mxu0 %v3788_v19  ;;  %2865 = vmatpush3.msra.mxu1 %v3794_v42 }
 0x266   :  { %2823 = vmatprep.subr.mxu0 %v3008_v0  ;;  %2866 = vmatprep.subr.mxu1 %v3008_v0 }
 0x267   :  { %2824 = vmatpush3.msra.mxu0 %v3791_v31  ;;  %2867 = vmatpush3.msra.mxu1 %v3849_v44 }
 0x268   :  { %2825 = vmatprep.subr.mxu0 %v3008_v0  ;;  %2868 = vmatprep.subr.mxu1 %v3008_v0 }
 0x269   :  { %2826 = vmatpush3.msra.mxu0 %v3801_v14  ;;  %2869 = vmatpush3.msra.mxu1 %v3857_v39 }
 0x26a   :  { %2827 = vmatprep.subr.mxu0 %v3008_v0  ;;  %2870 = vmatprep.subr.mxu1 %v3008_v0 }
 0x26b   :  { %2828 = vmatpush3.msra.mxu0 %v3805_v33  ;;  %2871 = vmatpush3.msra.mxu1 %v3866_v23 }
 0x26c   :  { %2829 = vmatprep.subr.mxu0 %v3008_v0  ;;  %2872 = vmatprep.subr.mxu1 %v3008_v0 }
 0x26d   :  { %2830 = vmatpush3.msra.mxu0 %v3817_v30  ;;  %2873 = vmatpush3.msra.mxu1 %v3878_v11 }
 0x26e   :  { %2831 = vmatprep.subr.mxu0 %v3008_v0  ;;  %2874 = vmatprep.subr.mxu1 %v3008_v0 }
 0x26f   :  { %2832 = vmatpush3.msra.mxu0 %v3855_v9  ;;  %2875 = vmatpush3.msra.mxu1 %v3892_v34 }
 0x270   :  { %2833 = vmatprep.subr.mxu0 %v3008_v0  ;;  %2876 = vmatprep.subr.mxu1 %v3008_v0 }
 0x271   :  { %2834 = vmatpush3.msra.mxu0 %v3864_v24  ;;  %2877 = vmatpush3.msra.mxu1 %v3899_v12 }
 0x272   :  { %2835 = vmatprep.subr.mxu0 %v3008_v0  ;;  %2878 = vmatprep.subr.mxu1 %v3008_v0 }
 0x273   :  { %2836 = vmatpush3.msra.mxu0 %v3876_v10  ;;  %2879 = vmatpush3.msra.mxu1 %v3912_v49 }
 0x274   :  { %2837 = vmatprep.subr.mxu0 %v3008_v0  ;;  %2880 = vmatprep.subr.mxu1 %v3008_v0 }
 0x275   :  { %2838 = vmatpush3.msra.mxu0 %v3888_v29  ;;  %2881 = vmatpush3.msra.mxu1 %v3922_v37 }
 0x276   :  { %2839 = vmatprep.subr.mxu0 %v3008_v0  ;;  %2883 = vmatmul.mubr.f32.vlgmr.msra.gmra.mxu1 %v1444_v46 }
 0x277   :  { %2920 = vmatprep.subr.mxu1 %v3008_v0  ;;  %2840 = vmatpush3.msra.mxu0 %v3903_v15 }
 0x278   :  { %2921 = vmatpush3.msra.mxu1 %v3760_v20  ;;  %2841 = vmatprep.subr.mxu0 %v3008_v0  ;;  %v4131_v20 = vand.u32 4294901760, %v3903_v15 }
 0x279   :  { %2922 = vmatprep.subr.mxu1 %v3008_v0  ;;  %2842 = vmatpush3.msra.mxu0 %v3910_v26 }
 0x27a   :  { %2923 = vmatpush3.msra.mxu1 %v3765_v27  ;;  %2843 = vmatprep.subr.mxu0 %v3008_v0  ;;  %v4133_v27 = vand.u32 4294901760, %v3920_v8 }
 0x27b   :  { %2924 = vmatprep.subr.mxu1 %v3008_v0  ;;  %2844 = vmatpush3.msra.mxu0 %v3920_v8 }
 0x27c   :  { %2925 = vmatpush3.msra.mxu1 %v3768_v35  ;;  %2845 = vmatprep.subr.mxu0 %v3008_v0  ;;  %v4134_v35 = vand.u32 4294901760, %v3935_v6 }
 0x27d   :  { %2926 = vmatprep.subr.mxu1 %v3008_v0  ;;  %2846 = vmatpush3.msra.mxu0 %v3935_v6 }
 0x27e   :  { %2847 = vmatprep.mubr.msk.f32.mxu0 %vm3009_vm0, %v3008_v0  ;;  %2927 = vmatpush3.msra.mxu1 %v3770_v40 }
 0x27f   :  { %2848 = vmatmul.mubr.f32.vlgmr.msra.gmra.mxu0 %v3955_v47  ;;  %2885 = vmatprep.subr.mxu0 %v3008_v0 }
 0x280   :  { %2928 = vmatprep.subr.mxu1 %v3008_v0  ;;  %2886 = vmatpush3.msra.mxu0 %v1455_v57 }
 0x281   :  { %2929 = vmatpush3.msra.mxu1 %v3772_v43  ;;  %2887 = vmatprep.subr.mxu0 %v3008_v0 }
 0x282   :  { %2930 = vmatprep.subr.mxu1 %v3008_v0  ;;  %2888 = vmatpush3.msra.mxu0 %v1462_v2 }
 0x283   :  { %2931 = vmatpush3.msra.mxu1 %v3780_v61  ;;  %2889 = vmatprep.subr.mxu0 %v3008_v0 }
 0x284   :  { %2932 = vmatprep.subr.mxu1 %v3008_v0  ;;  %2890 = vmatpush3.msra.mxu0 %v1469_v41 }
 0x285   :  { %2933 = vmatpush3.msra.mxu1 %v3782_v62  ;;  %2891 = vmatprep.subr.mxu0 %v3008_v0 }
 0x286   :  { %2934 = vmatprep.subr.mxu1 %v3008_v0  ;;  %2892 = vmatpush3.msra.mxu0 %v1476_v50 }
 0x287   :  { %2935 = vmatpush3.msra.mxu1 %v3794_v42  ;;  %2893 = vmatprep.subr.mxu0 %v3008_v0 }
 0x288   :  { %2936 = vmatprep.subr.mxu1 %v3008_v0  ;;  %2894 = vmatpush3.msra.mxu0 %v1483_v51 }
 0x289   :  { %2937 = vmatpush3.msra.mxu1 %v3849_v44  ;;  %2895 = vmatprep.subr.mxu0 %v3008_v0 }
 0x28a   :  { %2938 = vmatprep.subr.mxu1 %v3008_v0  ;;  %2896 = vmatpush3.msra.mxu0 %v1490_v16 }
 0x28b   :  { %2939 = vmatpush3.msra.mxu1 %v3857_v39  ;;  %2897 = vmatprep.subr.mxu0 %v3008_v0 }
 0x28c   :  { %2940 = vmatprep.subr.mxu1 %v3008_v0  ;;  %2898 = vmatpush3.msra.mxu0 %v1497_v32 }
 0x28d   :  { %2941 = vmatpush3.msra.mxu1 %v3866_v23  ;;  %2899 = vmatprep.subr.mxu0 %v3008_v0 }
 0x28e   :  { %2942 = vmatprep.subr.mxu1 %v3008_v0  ;;  %2900 = vmatpush3.msra.mxu0 %v1504_v36 }
 0x28f   :  { %2943 = vmatpush3.msra.mxu1 %v3878_v11  ;;  %2901 = vmatprep.subr.mxu0 %v3008_v0 }
 0x290   :  { %2944 = vmatprep.subr.mxu1 %v3008_v0  ;;  %2902 = vmatpush3.msra.mxu0 %v1511_v22 }
 0x291   :  { %2945 = vmatpush3.msra.mxu1 %v3892_v34  ;;  %2903 = vmatprep.subr.mxu0 %v3008_v0 }
 0x292   :  { %2946 = vmatprep.subr.mxu1 %v3008_v0  ;;  %2904 = vmatpush3.msra.mxu0 %v1518_v5 }
 0x293   :  { %2947 = vmatpush3.msra.mxu1 %v3899_v12  ;;  %2905 = vmatprep.subr.mxu0 %v3008_v0 }
 0x294   :  { %2948 = vmatprep.subr.mxu1 %v3008_v0  ;;  %2906 = vmatpush3.msra.mxu0 %v1525_v28 }
 0x295   :  { %2949 = vmatpush3.msra.mxu1 %v3912_v49  ;;  %2907 = vmatprep.subr.mxu0 %v3008_v0 }
 0x296   :  { %2950 = vmatprep.subr.mxu1 %v3008_v0  ;;  %2908 = vmatpush3.msra.mxu0 %v1532_v52 }
 0x297   :  { %2951 = vmatpush3.msra.mxu1 %v3922_v37  ;;  %2952 = vmatprep.mubr.msk.f32.mxu1 %vm3009_vm0, %v3008_v0 }
 0x298   :  { %2909 = vmatprep.subr.mxu0 %v3008_v0  ;;  %2953 = vmatmul.mubr.f32.vlgmr.msra.gmra.mxu1 %v3952_v54 }
 0x299   :  { %2910 = vmatpush3.msra.mxu0 %v4131_v20  ;;  %2917 = vmatprep.mubr.msk.f32.mxu0 %vm3009_vm0, %v3008_v0 }
 0x29a   :  { %2911 = vmatprep.subr.mxu0 %v3008_v0 }
 0x29b   :  { %2912 = vmatpush3.msra.mxu0 %v4132_v25 }
 0x29c   :  { %2913 = vmatprep.subr.mxu0 %v3008_v0 }
 0x29d   :  { %2914 = vmatpush3.msra.mxu0 %v4133_v27 }
 0x29e   :  { %2915 = vmatprep.subr.mxu0 %v3008_v0 }
 0x29f   :  { %2916 = vmatpush3.msra.mxu0 %v4134_v35 }
 0x2a0   :  { %2918 = vmatmul.mubr.f32.vlgmr.msra.gmra.mxu0 %v3952_v54 }
 0x316   :  { %v1599_v40 = vpop.f32.mrf.mxu1 }
 0x318   :  { %v2814_v43 = vpop.f32.mrf.mxu1 }
 0x31e   :  { %v1448_v57 = vpop.f32.mrf.mxu0 }
 0x31f   :  { %v1600_v42 = vadd.f32 %v1599_v40, %v1448_v57 }
 0x320   :  { %v2779_v59 = vpop.f32.mrf.mxu0 }
 0x336   :  { %v1792_v61 = vpop.f32.mrf.mxu1 }
 0x338   :  { %v2884_v62 = vpop.f32.mrf.mxu1 }
 0x33f   :  { %v1703_v63 = vpop.f32.mrf.mxu0 }
 0x340   :  { %v1704_v14 = vadd.f32 %v1703_v63, %v1600_v42 }
 0x341   :  { %v2849_v19 = vpop.f32.mrf.mxu0 }
 0x342   :  { %v1793_v33 = vadd.f32 %v1792_v61, %v1704_v14 }
 0x358   :  { %v1998_v31 = vpop.f32.mrf.mxu1 }
 0x35a   :  { %v2954_v2 = vpop.f32.mrf.mxu1 }
 0x360   :  { %v1911_v41 = vpop.f32.mrf.mxu0 }
 0x361   :  { %v1912_v0 = vadd.f32 %v1911_v41, %v1793_v33 }
 0x362   :  { %v2919_v50 = vpop.f32.mrf.mxu0 }
 0x363   :  { %v1999_v51 = vadd.f32 %v1998_v31, %v1912_v0 }
 0x365   :  { %2003 = vst.msk [vmem:[#allocation5] sm:$0x3] %vm2002_vm1, %v1999_v51 }
 0x366   :  { %2992 = shalt.err (!%p2989_p9)
}
 0x367   :  { %2013 = dma.vmem_to_hbm [thread:$0]  %s2011_s17, 32, %s4118_s2, [#allocation4]  }
 0x368   :  { %3003 = dma.done.wait [#allocation4], 32  }
 0x369   :  { %3004 = vsyncadd [#allocation4], 4294967264 }
 0x36a   :  { %2017 = vsyncpa [#allocation3], 1 }
 0x36b   :  { %2018 = vsyncpa [#allocation4], 1 }

</bundles_post_ra>
